<compile_context>
chip_gen: v7x
topology: tpu7x:2x2x1
jax: 0.10.0
libtpu: 0.0.40
codegen_flags: <defaults>
</compile_context>

<pallas_src>
import numpy as np
import jax
import jax.numpy as jnp
from jax import lax
from jax.experimental import pallas as pl
from jax.experimental.pallas import tpu as pltpu

POOL_SIZES = (2, 3, 5, 6)


# ----------------------------------------------------------------------------
# Precomputed bilinear (align_corners=False, PyTorch semantics) upsample matrices
# ----------------------------------------------------------------------------
def _resize_matrix_1d(src, dst):
    """(src, dst) matrix M with out[d] = sum_s M[s, d] * in[s]."""
    scale = src / dst
    m = np.zeros((src, dst), np.float32)
    for d in range(dst):
        s = max((d + 0.5) * scale - 0.5, 0.0)
        i0 = min(int(np.floor(s)), src - 1)
        i1 = min(i0 + 1, src - 1)
        t = s - i0
        m[i0, d] += 1.0 - t
        m[i1, d] += t
    return m


def _upsample_matrix_2d(ho, wo, h, w):
    mh = _resize_matrix_1d(ho, h)                # (ho, h)
    mw = _resize_matrix_1d(wo, w)                # (wo, w)
    u = np.einsum('ih,jw->ijhw', mh, mw)         # (ho, wo, h, w)
    return u.reshape(ho * wo, h * w).astype(np.float32)


# ----------------------------------------------------------------------------
# Fused Pallas kernel: shared 1x1 conv + 4x bilinear upsample + channel concat.
# Grid = (B,). Every load/store is lane-dense (last dim = H*W, multiple of 128).
# ----------------------------------------------------------------------------
def _rmp_kernel(w_ref, b_ref, x_ref,
                p1_ref, p2_ref, p3_ref, p4_ref,
                u1_ref, u2_ref, u3_ref, u4_ref,
                o_ref):
    w = w_ref[...]          # (1, C) in VMEM
    b = b_ref[0]            # scalar bias in SMEM

    def branch(p_ref, u_ref, row):
        # 1x1 conv (channel contraction) on the MXU: (1, C) @ (C, N) -> (1, N)
        conv = jnp.dot(w, p_ref[0],
                       preferred_element_type=jnp.float32,
                       precision=jax.lax.Precision.HIGHEST)
        # bilinear upsample as a matmul: (1, N) @ (N, H*W) -> (1, H*W)
        up = jnp.dot(conv, u_ref[...],
                     preferred_element_type=jnp.float32,
                     precision=jax.lax.Precision.HIGHEST) + b
        o_ref[0, row:row + 1, :] = up

    branch(p1_ref, u1_ref, 0)
    branch(p2_ref, u2_ref, 1)
    branch(p3_ref, u3_ref, 2)
    branch(p4_ref, u4_ref, 3)
    # passthrough channels (the `x` part of the concat), single dense store
    o_ref[0, 4:, :] = x_ref[0]


def rmp_block_forward(x, w, b):
    """x: (B, C, H, W) f32; w: (C,) shared 1x1-conv weight; b: scalar bias."""
    B, C, H, W = x.shape
    HW = H * W
    x_flat = x.reshape(B, C, HW)

    pooled, umats = [], []
    for k in POOL_SIZES:
        p = lax.reduce_window(x, -jnp.inf, lax.max,
                              window_dimensions=(1, 1, k, k),
                              window_strides=(1, 1, k, k),
                              padding='VALID')          # floor-mode MaxPool2d
        ho, wo = p.shape[2], p.shape[3]
        pooled.append(p.reshape(B, C, ho * wo))
        umats.append(jnp.asarray(_upsample_matrix_2d(ho, wo, H, W)))

    w_row = w.reshape(1, C).astype(jnp.float32)
    b_arr = jnp.asarray(b, jnp.float32).reshape(1)

    in_specs = [
        pl.BlockSpec((1, C), lambda bi: (0, 0)),                    # conv weight row
        pl.BlockSpec(memory_space=pltpu.MemorySpace.SMEM),          # bias scalar
        pl.BlockSpec((1, C, HW), lambda bi: (bi, 0, 0)),            # x (flattened HW)
    ]
    for p in pooled:
        n = p.shape[-1]
        in_specs.append(pl.BlockSpec((1, C, n), lambda bi: (bi, 0, 0)))
    for u in umats:
        n = u.shape[0]
        in_specs.append(pl.BlockSpec((n, HW), lambda bi: (0, 0)))

    out_flat = pl.pallas_call(
        _rmp_kernel,
        out_shape=jax.ShapeDtypeStruct((B, C + 4, HW), jnp.float32),
        grid=(B,),
        in_specs=in_specs,
        out_specs=pl.BlockSpec((1, C + 4, HW), lambda bi: (bi, 0, 0)),
        compiler_params=pltpu.CompilerParams(
            dimension_semantics=("parallel",)),
    )(w_row, b_arr, x_flat, *pooled, *umats)

    return out_flat.reshape(B, C + 4, H, W)


# ----------------------------------------------------------------------------
# Pure-JAX reference (gather-based bilinear, structurally different path)
# ----------------------------------------------------------------------------
def _bilinear_resize_ref(img, H, W):
    """img: (B, Ho, Wo) -> (B, H, W), PyTorch bilinear align_corners=False."""
    _, Ho, Wo = img.shape

    def coords(S, D):
        d = jnp.arange(D, dtype=jnp.float32)
        src = jnp.maximum((d + 0.5) * (S / D) - 0.5, 0.0)
        i0 = jnp.minimum(jnp.floor(src).astype(jnp.int32), S - 1)
        i1 = jnp.minimum(i0 + 1, S - 1)
        t = src - i0.astype(jnp.float32)
        return i0, i1, t

    y0, y1, ty = coords(Ho, H)
    x0, x1, tx = coords(Wo, W)
    top, bot = img[:, y0, :], img[:, y1, :]
    rows = top * (1.0 - ty)[None, :, None] + bot * ty[None, :, None]
    left, right = rows[:, :, x0], rows[:, :, x1]
    return left * (1.0 - tx)[None, None, :] + right * tx[None, None, :]


def rmp_ref(x, w, b):
    B, C, H, W = x.shape
    subs = []
    for k in POOL_SIZES:
        p = lax.reduce_window(x, -jnp.inf, lax.max,
                              window_dimensions=(1, 1, k, k),
                              window_strides=(1, 1, k, k),
                              padding='VALID')
        conv = jnp.einsum('bchw,c->bhw', p, w,
                          precision=jax.lax.Precision.HIGHEST) + b
        subs.append(_bilinear_resize_ref(conv, H, W)[:, None])
    return jnp.concatenate(subs + [x], axis=1)


if __name__ == "__main__":
    B, C, H, W = 2, 4, 16, 16
    key = jax.random.PRNGKey(0)
    kx, kw, kb = jax.random.split(key, 3)
    x = jax.random.normal(kx, (B, C, H, W), jnp.float32)
    # kaiming-style init for the shared 1x1 conv (C -> 1 channel) + small bias
    w = ((2.0 / C) ** 0.5) * jax.random.normal(kw, (C,), jnp.float32)
    b = 0.01 * jax.random.normal(kb, (), jnp.float32)

    out = rmp_block_forward(x, w, b)
    out = jax.block_until_ready(out)
    assert out.shape == (B, C + 4, H, W)

    ref = rmp_ref(x, w, b)
    max_err = float(jnp.max(jnp.abs(out - ref)))
    # tolerance leaves headroom for MXU pass rounding while still catching
    # any structural error (wrong pooling / interpolation / concat order ~ O(1)).
    if max_err > 1e-2:
        raise RuntimeError(f"mismatch vs reference: max abs err = {max_err}")

    print("KERNEL_OK")
</pallas_src>

<mosaic_0001>
module attributes {stable_mosaic.version = 11 : i64} {
  func.func @_rmp_kernel(%arg0: i32, %arg1: memref<1x4xf32, #tpu.memory_space<vmem>>, %arg2: memref<1xf32, #tpu.memory_space<smem>>, %arg3: memref<1x4x256xf32, #tpu.memory_space<vmem>>, %arg4: memref<1x4x64xf32, #tpu.memory_space<vmem>>, %arg5: memref<1x4x25xf32, #tpu.memory_space<vmem>>, %arg6: memref<1x4x9xf32, #tpu.memory_space<vmem>>, %arg7: memref<1x4x4xf32, #tpu.memory_space<vmem>>, %arg8: memref<64x256xf32, #tpu.memory_space<vmem>>, %arg9: memref<25x256xf32, #tpu.memory_space<vmem>>, %arg10: memref<9x256xf32, #tpu.memory_space<vmem>>, %arg11: memref<4x256xf32, #tpu.memory_space<vmem>>, %arg12: memref<1x8x256xf32, #tpu.memory_space<vmem>>) attributes {dimension_semantics = [#tpu.dimension_semantics<parallel>], iteration_bounds = array<i64: 2>, scalar_prefetch = 0 : i64, scratch_operands = 0 : i64, tpu.core_type = #tpu.core_type<tc>, window_params = [{pipeline_mode = #tpu.pipeline_mode<synchronous>, transform_indices = @transform_0, window_bounds = array<i64: 1, 4>}, {transform_indices = @transform_1, window_bounds = array<i64: 1>}, {transform_indices = @transform_2, window_bounds = array<i64: 1, 4, 256>}, {transform_indices = @transform_3, window_bounds = array<i64: 1, 4, 64>}, {transform_indices = @transform_4, window_bounds = array<i64: 1, 4, 25>}, {transform_indices = @transform_5, window_bounds = array<i64: 1, 4, 9>}, {transform_indices = @transform_6, window_bounds = array<i64: 1, 4, 4>}, {pipeline_mode = #tpu.pipeline_mode<synchronous>, transform_indices = @transform_7, window_bounds = array<i64: 64, 256>}, {pipeline_mode = #tpu.pipeline_mode<synchronous>, transform_indices = @transform_8, window_bounds = array<i64: 25, 256>}, {pipeline_mode = #tpu.pipeline_mode<synchronous>, transform_indices = @transform_9, window_bounds = array<i64: 9, 256>}, {pipeline_mode = #tpu.pipeline_mode<synchronous>, transform_indices = @transform_10, window_bounds = array<i64: 4, 256>}, {transform_indices = @transform_11, window_bounds = array<i64: 1, 8, 256>}]} {
    %c0 = arith.constant 0 : index
    %c0_0 = arith.constant 0 : index
    %0 = vector.load %arg1[%c0, %c0_0] : memref<1x4xf32, #tpu.memory_space<vmem>>, vector<1x4xf32>
    %c0_1 = arith.constant 0 : index
    %1 = memref.load %arg2[%c0_1] : memref<1xf32, #tpu.memory_space<smem>>
    %c0_2 = arith.constant 0 : index
    %c0_3 = arith.constant 0 : index
    %c0_4 = arith.constant 0 : index
    %2 = vector.load %arg4[%c0_2, %c0_3, %c0_4] : memref<1x4x64xf32, #tpu.memory_space<vmem>>, vector<1x4x64xf32>
    %3 = vector.shape_cast %2 : vector<1x4x64xf32> to vector<4x64xf32>
    %cst = arith.constant dense<0.000000e+00> : vector<1x64xf32>
    %4 = tpu.matmul %0, %3, %cst {dimension_numbers = #tpu.dot_dimension_numbers<[1], [0], [0], [1], [0, 0, 1, 1], [], []>, precision = #tpu.contract_precision<fp32>} : vector<1x4xf32>, vector<4x64xf32>, vector<1x64xf32> -> vector<1x64xf32>
    %c0_5 = arith.constant 0 : index
    %c0_6 = arith.constant 0 : index
    %5 = vector.load %arg8[%c0_5, %c0_6] : memref<64x256xf32, #tpu.memory_space<vmem>>, vector<64x256xf32>
    %cst_7 = arith.constant dense<0.000000e+00> : vector<1x256xf32>
    %6 = tpu.matmul %4, %5, %cst_7 {dimension_numbers = #tpu.dot_dimension_numbers<[1], [0], [0], [1], [0, 0, 1, 1], [], []>, precision = #tpu.contract_precision<fp32>} : vector<1x64xf32>, vector<64x256xf32>, vector<1x256xf32> -> vector<1x256xf32>
    %7 = vector.broadcast %1 : f32 to vector<1x256xf32>
    %8 = arith.addf %6, %7 : vector<1x256xf32>
    %c0_8 = arith.constant 0 : index
    %c0_9 = arith.constant 0 : index
    %c0_10 = arith.constant 0 : index
    %9 = vector.load %arg12[%c0_8, %c0_9, %c0_10] : memref<1x8x256xf32, #tpu.memory_space<vmem>>, vector<1x1x256xf32>
    %10 = vector.shape_cast %9 : vector<1x1x256xf32> to vector<1x256xf32>
    %11 = vector.shape_cast %8 : vector<1x256xf32> to vector<1x1x256xf32>
    tpu.vector_store %arg12[%c0_8, %c0_9, %c0_10], %11 {strides = array<i32>} : memref<1x8x256xf32, #tpu.memory_space<vmem>>, vector<1x1x256xf32>,
    %c0_11 = arith.constant 0 : index
    %c0_12 = arith.constant 0 : index
    %c0_13 = arith.constant 0 : index
    %12 = vector.load %arg5[%c0_11, %c0_12, %c0_13] : memref<1x4x25xf32, #tpu.memory_space<vmem>>, vector<1x4x25xf32>
    %13 = vector.shape_cast %12 : vector<1x4x25xf32> to vector<4x25xf32>
    %cst_14 = arith.constant dense<0.000000e+00> : vector<1x25xf32>
    %14 = tpu.matmul %0, %13, %cst_14 {dimension_numbers = #tpu.dot_dimension_numbers<[1], [0], [0], [1], [0, 0, 1, 1], [], []>, precision = #tpu.contract_precision<fp32>} : vector<1x4xf32>, vector<4x25xf32>, vector<1x25xf32> -> vector<1x25xf32>
    %c0_15 = arith.constant 0 : index
    %c0_16 = arith.constant 0 : index
    %15 = vector.load %arg9[%c0_15, %c0_16] : memref<25x256xf32, #tpu.memory_space<vmem>>, vector<25x256xf32>
    %cst_17 = arith.constant dense<0.000000e+00> : vector<1x256xf32>
    %16 = tpu.matmul %14, %15, %cst_17 {dimension_numbers = #tpu.dot_dimension_numbers<[1], [0], [0], [1], [0, 0, 1, 1], [], []>, precision = #tpu.contract_precision<fp32>} : vector<1x25xf32>, vector<25x256xf32>, vector<1x256xf32> -> vector<1x256xf32>
    %17 = vector.broadcast %1 : f32 to vector<1x256xf32>
    %18 = arith.addf %16, %17 : vector<1x256xf32>
    %c0_18 = arith.constant 0 : index
    %c1 = arith.constant 1 : index
    %c0_19 = arith.constant 0 : index
    %19 = vector.load %arg12[%c0_18, %c1, %c0_19] : memref<1x8x256xf32, #tpu.memory_space<vmem>>, vector<1x1x256xf32>
    %20 = vector.shape_cast %19 : vector<1x1x256xf32> to vector<1x256xf32>
    %21 = vector.shape_cast %18 : vector<1x256xf32> to vector<1x1x256xf32>
    tpu.vector_store %arg12[%c0_18, %c1, %c0_19], %21 {strides = array<i32>} : memref<1x8x256xf32, #tpu.memory_space<vmem>>, vector<1x1x256xf32>,
    %c0_20 = arith.constant 0 : index
    %c0_21 = arith.constant 0 : index
    %c0_22 = arith.constant 0 : index
    %22 = vector.load %arg6[%c0_20, %c0_21, %c0_22] : memref<1x4x9xf32, #tpu.memory_space<vmem>>, vector<1x4x9xf32>
    %23 = vector.shape_cast %22 : vector<1x4x9xf32> to vector<4x9xf32>
    %cst_23 = arith.constant dense<0.000000e+00> : vector<1x9xf32>
    %24 = tpu.matmul %0, %23, %cst_23 {dimension_numbers = #tpu.dot_dimension_numbers<[1], [0], [0], [1], [0, 0, 1, 1], [], []>, precision = #tpu.contract_precision<fp32>} : vector<1x4xf32>, vector<4x9xf32>, vector<1x9xf32> -> vector<1x9xf32>
    %c0_24 = arith.constant 0 : index
    %c0_25 = arith.constant 0 : index
    %25 = vector.load %arg10[%c0_24, %c0_25] : memref<9x256xf32, #tpu.memory_space<vmem>>, vector<9x256xf32>
    %cst_26 = arith.constant dense<0.000000e+00> : vector<1x256xf32>
    %26 = tpu.matmul %24, %25, %cst_26 {dimension_numbers = #tpu.dot_dimension_numbers<[1], [0], [0], [1], [0, 0, 1, 1], [], []>, precision = #tpu.contract_precision<fp32>} : vector<1x9xf32>, vector<9x256xf32>, vector<1x256xf32> -> vector<1x256xf32>
    %27 = vector.broadcast %1 : f32 to vector<1x256xf32>
    %28 = arith.addf %26, %27 : vector<1x256xf32>
    %c0_27 = arith.constant 0 : index
    %c2 = arith.constant 2 : index
    %c0_28 = arith.constant 0 : index
    %29 = vector.load %arg12[%c0_27, %c2, %c0_28] : memref<1x8x256xf32, #tpu.memory_space<vmem>>, vector<1x1x256xf32>
    %30 = vector.shape_cast %29 : vector<1x1x256xf32> to vector<1x256xf32>
    %31 = vector.shape_cast %28 : vector<1x256xf32> to vector<1x1x256xf32>
    tpu.vector_store %arg12[%c0_27, %c2, %c0_28], %31 {strides = array<i32>} : memref<1x8x256xf32, #tpu.memory_space<vmem>>, vector<1x1x256xf32>,
    %c0_29 = arith.constant 0 : index
    %c0_30 = arith.constant 0 : index
    %c0_31 = arith.constant 0 : index
    %32 = vector.load %arg7[%c0_29, %c0_30, %c0_31] : memref<1x4x4xf32, #tpu.memory_space<vmem>>, vector<1x4x4xf32>
    %33 = vector.shape_cast %32 : vector<1x4x4xf32> to vector<4x4xf32>
    %cst_32 = arith.constant dense<0.000000e+00> : vector<1x4xf32>
    %34 = tpu.matmul %0, %33, %cst_32 {dimension_numbers = #tpu.dot_dimension_numbers<[1], [0], [0], [1], [0, 0, 1, 1], [], []>, precision = #tpu.contract_precision<fp32>} : vector<1x4xf32>, vector<4x4xf32>, vector<1x4xf32> -> vector<1x4xf32>
    %c0_33 = arith.constant 0 : index
    %c0_34 = arith.constant 0 : index
    %35 = vector.load %arg11[%c0_33, %c0_34] : memref<4x256xf32, #tpu.memory_space<vmem>>, vector<4x256xf32>
    %cst_35 = arith.constant dense<0.000000e+00> : vector<1x256xf32>
    %36 = tpu.matmul %34, %35, %cst_35 {dimension_numbers = #tpu.dot_dimension_numbers<[1], [0], [0], [1], [0, 0, 1, 1], [], []>, precision = #tpu.contract_precision<fp32>} : vector<1x4xf32>, vector<4x256xf32>, vector<1x256xf32> -> vector<1x256xf32>
    %37 = vector.broadcast %1 : f32 to vector<1x256xf32>
    %38 = arith.addf %36, %37 : vector<1x256xf32>
    %c0_36 = arith.constant 0 : index
    %c3 = arith.constant 3 : index
    %c0_37 = arith.constant 0 : index
    %39 = vector.load %arg12[%c0_36, %c3, %c0_37] : memref<1x8x256xf32, #tpu.memory_space<vmem>>, vector<1x1x256xf32>
    %40 = vector.shape_cast %39 : vector<1x1x256xf32> to vector<1x256xf32>
    %41 = vector.shape_cast %38 : vector<1x256xf32> to vector<1x1x256xf32>
    tpu.vector_store %arg12[%c0_36, %c3, %c0_37], %41 {strides = array<i32>} : memref<1x8x256xf32, #tpu.memory_space<vmem>>, vector<1x1x256xf32>,
    %c0_38 = arith.constant 0 : index
    %c0_39 = arith.constant 0 : index
    %c0_40 = arith.constant 0 : index
    %42 = vector.load %arg3[%c0_38, %c0_39, %c0_40] : memref<1x4x256xf32, #tpu.memory_space<vmem>>, vector<1x4x256xf32>
    %43 = vector.shape_cast %42 : vector<1x4x256xf32> to vector<4x256xf32>
    %c0_41 = arith.constant 0 : index
    %c4 = arith.constant 4 : index
    %c0_42 = arith.constant 0 : index
    %44 = vector.load %arg12[%c0_41, %c4, %c0_42] : memref<1x8x256xf32, #tpu.memory_space<vmem>>, vector<1x4x256xf32>
    %45 = vector.shape_cast %44 : vector<1x4x256xf32> to vector<4x256xf32>
    %46 = vector.shape_cast %43 : vector<4x256xf32> to vector<1x4x256xf32>
    tpu.vector_store %arg12[%c0_41, %c4, %c0_42], %46 {strides = array<i32>} : memref<1x8x256xf32, #tpu.memory_space<vmem>>, vector<1x4x256xf32>,
    return
  }
  func.func @transform_0(%arg0: i32) -> (i32, i32) {
    %c0_i32 = arith.constant 0 : i32
    %c0_i32_0 = arith.constant 0 : i32
    %c0_i32_1 = arith.constant 0 : i32
    return %c0_i32, %c0_i32_0 : i32, i32
  }
  func.func @transform_1(%arg0: i32) -> i32 {
    %c0_i32 = arith.constant 0 : i32
    %c0_i32_0 = arith.constant 0 : i32
    return %c0_i32 : i32
  }
  func.func @transform_2(%arg0: i32) -> (i32, i32, i32) {
    %c0_i32 = arith.constant 0 : i32
    %c0_i32_0 = arith.constant 0 : i32
    %c0_i32_1 = arith.constant 0 : i32
    return %arg0, %c0_i32, %c0_i32_0 : i32, i32, i32
  }
  func.func @transform_3(%arg0: i32) -> (i32, i32, i32) {
    %c0_i32 = arith.constant 0 : i32
    %c0_i32_0 = arith.constant 0 : i32
    %c0_i32_1 = arith.constant 0 : i32
    return %arg0, %c0_i32, %c0_i32_0 : i32, i32, i32
  }
  func.func @transform_4(%arg0: i32) -> (i32, i32, i32) {
    %c0_i32 = arith.constant 0 : i32
    %c0_i32_0 = arith.constant 0 : i32
    %c0_i32_1 = arith.constant 0 : i32
    return %arg0, %c0_i32, %c0_i32_0 : i32, i32, i32
  }
  func.func @transform_5(%arg0: i32) -> (i32, i32, i32) {
    %c0_i32 = arith.constant 0 : i32
    %c0_i32_0 = arith.constant 0 : i32
    %c0_i32_1 = arith.constant 0 : i32
    return %arg0, %c0_i32, %c0_i32_0 : i32, i32, i32
  }
  func.func @transform_6(%arg0: i32) -> (i32, i32, i32) {
    %c0_i32 = arith.constant 0 : i32
    %c0_i32_0 = arith.constant 0 : i32
    %c0_i32_1 = arith.constant 0 : i32
    return %arg0, %c0_i32, %c0_i32_0 : i32, i32, i32
  }
  func.func @transform_7(%arg0: i32) -> (i32, i32) {
    %c0_i32 = arith.constant 0 : i32
    %c0_i32_0 = arith.constant 0 : i32
    %c0_i32_1 = arith.constant 0 : i32
    return %c0_i32, %c0_i32_0 : i32, i32
  }
  func.func @transform_8(%arg0: i32) -> (i32, i32) {
    %c0_i32 = arith.constant 0 : i32
    %c0_i32_0 = arith.constant 0 : i32
    %c0_i32_1 = arith.constant 0 : i32
    return %c0_i32, %c0_i32_0 : i32, i32
  }
  func.func @transform_9(%arg0: i32) -> (i32, i32) {
    %c0_i32 = arith.constant 0 : i32
    %c0_i32_0 = arith.constant 0 : i32
    %c0_i32_1 = arith.constant 0 : i32
    return %c0_i32, %c0_i32_0 : i32, i32
  }
  func.func @transform_10(%arg0: i32) -> (i32, i32) {
    %c0_i32 = arith.constant 0 : i32
    %c0_i32_0 = arith.constant 0 : i32
    %c0_i32_1 = arith.constant 0 : i32
    return %c0_i32, %c0_i32_0 : i32, i32
  }
  func.func @transform_11(%arg0: i32) -> (i32, i32, i32) {
    %c0_i32 = arith.constant 0 : i32
    %c0_i32_0 = arith.constant 0 : i32
    %c0_i32_1 = arith.constant 0 : i32
    return %arg0, %c0_i32, %c0_i32_0 : i32, i32, i32
  }
}

</mosaic_0001>

<bundles_post_ra>
// kernel: tpu_custom_call.1
= control target key start
LH: loop header
LB: loop body
LE: loop exit
PB: predicated region body
PF: predicated region fallthrough
CT: control target
= control target key end

     0   :  { %s6852_s0 = inlined_call_operand.vmem [shape: f32[1,4], index: 0, kind: input, shape index: {}]   ;;  %s6853_s1 = inlined_call_operand.<no memory space> [shape: f32[1], index: 1, kind: input, shape index: {}]   ;;  %s6854_s2 = inlined_call_operand.hbm [shape: f32[2,4,256], index: 2, kind: input, shape index: {}]   ;;  %s6855_s3 = inlined_call_operand.hbm [shape: f32[2,4,64], index: 3, kind: input, shape index: {}]   ;;  %s6856_s4 = inlined_call_operand.hbm [shape: f32[2,4,25], index: 4, kind: input, shape index: {}]   ;;  %s6857_s5 = inlined_call_operand.hbm [shape: f32[2,4,9], index: 5, kind: input, shape index: {}]   ;;  %s6858_s6 = inlined_call_operand.hbm [shape: f32[2,4,4], index: 6, kind: input, shape index: {}]   ;;  %s6859_s7 = inlined_call_operand.hbm [shape: f32[64,256], index: 7, kind: input, shape index: {}]   ;;  %s6860_s8 = inlined_call_operand.hbm [shape: f32[25,256], index: 8, kind: input, shape index: {}]   ;;  %s6861_s9 = inlined_call_operand.vmem [shape: f32[9,256], index: 9, kind: input, shape index: {}]   ;;  %s6862_s10 = inlined_call_operand.hbm [shape: f32[4,256], index: 10, kind: input, shape index: {}]   ;;  %s6863_s11 = inlined_call_operand.hbm [shape: f32[2,8,256], index: 11, kind: output, shape index: {}]  }
   0x1   :  { %6932 = sst [smem:[#allocation47_spill]] %s6852_s0 }
   0x2   :  { %6933 = sst [smem:[#allocation48_spill]] %s6855_s3 }
   0x3   :  { %6934 = sst [smem:[#allocation49_spill]] %s6857_s5 }
   0x4   :  { %6935 = sst [smem:[#allocation50_spill]] %s6859_s7 }
   0x5   :  { %6936 = sst [smem:[#allocation51_spill]] %s6861_s9 }
   0x6   :  { %6937 = sst [smem:[#allocation52_spill]] %s6863_s11 }
   0x7   :  { %16 = sst [smem:[#allocation2]] %s6853_s1 }
   0x8   :  { %17 = vsyncpa [#allocation4], 0 }
   0x9   :  { %19 = vsyncpa [#allocation4 + $0x1], 0 }
   0xa   :  { %20 = vsyncpa [#allocation7], 0 }
   0xb   :  { %22 = vsyncpa [#allocation7 + $0x1], 0 }
   0xc   :  { %23 = vsyncpa [#allocation10], 0 }
   0xd   :  { %25 = vsyncpa [#allocation10 + $0x1], 0 }
   0xe   :  { %26 = vsyncpa [#allocation13], 0 }
   0xf   :  { %27 = vsyncpa [#allocation16], 0 }
  0x10   :  { %28 = vsyncpa [#allocation5], 0 }
  0x11   :  { %30 = vsyncpa [#allocation5 + $0x1], 0  ;;  %s5858_s19 = smov 0   ;;  %s5860_s20 = smov 0  }
  0x12   :  { %s5862_s21 = smov 0   ;;  %s5864_s22 = smov 0  }
  0x13 LB: > { %6938 = sst [smem:[#allocation24_spill]] %s5767_s19  ;;  %s5879_s1 = sadd.s32 4294967295, %s5779_s22   ;;  %s5779_s22 = sphi %s5864_s22, %s7046_s22   ;;  %s5775_s21 = sphi %s5862_s21, %s7048_s21   ;;  %s5771_s20 = sphi %s5860_s20, %s7050_s20   ;;  %s5767_s19 = sphi %s5858_s19, %s7049_s19  }
  0x14   : > { %6939 = sst [smem:[#allocation25_spill]] %s5775_s21  ;;  %s4898_s23 = sadd.s32 4294967294, %s5779_s22  }
  0x15   : > { %6940 = sst [smem:[#allocation26_spill]] %s5879_s1  ;;  %p98_p0 = scmp.ne.s32.totalorder %s5771_s20, %s5767_s19 }
  0x16   : > { %p6865_p1 = scmp.eq.s32.totalorder %s5879_s1, 0  ;;  %p316_p3 = scmp.eq.s32.totalorder %s4898_s23, 1 }
  0x17   : > { %p4899_p5 = scmp.ge.s32.totalorder %s5779_s22, 1  ;;  %p323_p7 = scmp.lt.s32.totalorder %s5779_s22, 3 }
  0x18   : > { %p5888_p4 = por %p6865_p1, %p98_p0  ;;  %p5893_p6 = por %p316_p3, %p98_p0 }
  0x19   : > { %p5898_p8 = pnand %p4899_p5, %p323_p7  ;;  %s5781_s27 = smov [#allocation12]  }
  0x1a   : > { %s6941_s24 = scalar_select %p5888_p4, 1, 0 }
  0x1b   : > { %s6943_s25 = scalar_select %p5893_p6, 1, 0 }
  0x1c   : > { %6942 = sst [smem:[#allocation27_spill]] %s6941_s24  ;;  %s341_s28 = sshll.u32 %s5781_s27, 4  ;;  %s5902_s28 = int_to_ptr.vmem [resolvable:$true] %s341_s28 }
  0x1d   : > { %6944 = sst [smem:[#allocation28_spill]] %s6943_s25  ;;  %p5383_p9 = pneg %p5898_p8 }
  0x1e   : > { %s6945_s26 = scalar_select %p5898_p8, 1, 0 }
  0x1f   : > { %p5909_p11 = pnand %p5383_p9, %p6865_p1  ;;  %s5914_s30 = sadd.s32 1, %s5779_s22  }
  0x20   : > { %6947 = sst [smem:[#allocation29_spill]] %s5914_s30  ;;  %s85_s12 = sadd.s32 1, %s5775_s21 }
  0x21   : > { %s6946_s29 = scalar_select %p5909_p11, 1, 0 }
  0x22   : > { %s82_s13 = ssub.s32 %s5779_s22, %s5914_s30  ;;  %s6948_s7 = sld [smem:[#allocation50_spill]] }
  0x23   : > { %p5927_p13 = pneg %p5909_p11 }
  0x25   : > { %s6949_s23 = scalar_select %p5927_p13, 1, 0 }
  0x28   : > { %s5463_s16 = scalar_lea.hbm %s6948_s7, 2048 }
  0x29   : > { %p5464_p12 = scmp.ne.s32.totalorder %s6948_s7, %s5463_s16  ;;  %p5470_p5 = scmp.lt.u32.totalorder %s5463_s16, %s6948_s7 }
  0x2b   : > { %p5466_p0 = pnand %p5927_p13, %p5464_p12 }
  0x2d   : > { %p5467_p3 = pneg %p5466_p0 }
  0x2f   : > { %p5472_p7 = pnand %p5470_p5, %p5467_p3 }
  0x31   : > { %5475 = shalt.err (!%p5472_p7)
}
  0x32   : > { %s5476_s14 = scalar_lea.vmem %s5902_s28, 2048  ;;  %p5484_p2 = scmp.lt.s32.totalorder %s5902_s28, %s5902_s28 }
  0x33   : > { %p5477_p9 = scmp.ne.s32.totalorder %s5902_s28, %s5476_s14  ;;  %p5485_p6 = scmp.lt.s32.totalorder %s5476_s14, %s5476_s14 }
  0x35   : > { %p5479_p10 = pnand %p5477_p9, %p5927_p13  ;;  %p5486_p12 = por %p5485_p6, %p5484_p2 }
  0x37   : > { %p5480_p1 = pneg %p5479_p10 }
  0x39   : > { %p5487_p0 = pnand %p5486_p12, %p5480_p1 }
  0x3b   : > { %5490 = shalt.err (!%p5487_p0)
}
  0x3c   : > { %s6868_s15 = smov 256   ;;  %s6869_s25 = smov 16  }
  0x3d   : > { %5386 = dma.hbm_to_vmem [thread:$0]  (!%p5909_p11), %s6948_s7, 2048, %s5902_s28, [#allocation13], %s6868_s15, %s6868_s15, %s6869_s25  }
  0x3e   : > { %p83_p1 = scmp.eq.s32.totalorder %s82_s13, 0  ;;  %p92_p2 = scmp.ne.s32.totalorder %s5775_s21, %s5771_s20 }
  0x3f   : > { %p93_p6 = scmp.eq.s32.totalorder %s5779_s22, 0  ;;  %p5416_p10 = scmp.lt.s32.totalorder %s5779_s22, 2 }
  0x40   : > { %s5956_s18 = scalar_select %p83_p1, %s5775_s21, %s85_s12  }
  0x41   : > { %p94_p3 = por %p93_p6, %p92_p2  ;;  %p6951_p5 = scmp.eq.s32.totalorder %s5879_s1, 1 }
  0x42   : > { %6950 = sst [smem:[#allocation30_spill]] %s5956_s18  ;;  %s5965_s14 = sand.u32 1, %s5775_s21  }
  0x43   : > { %p5960_p7 = por %p6951_p5, %p92_p2  ;;  %p5968_p9 = pnand %p5416_p10, %p94_p3 }
  0x44   : > { %s5973_s28 = sshll.u32 %s5965_s14, 2  ;;  %s5976_s12 = sshll.u32 %s5779_s22, 6 }
  0x45   : > { %s6952_s27 = scalar_select %p5960_p7, 1, 0 }
  0x46   : > { %s6954_s16 = scalar_select %p5968_p9, 1, 0 }
  0x47   : > { %6953 = sst [smem:[#allocation31_spill]] %s6952_s27  ;;  %s6955_s3 = sld [smem:[#allocation48_spill]] }
  0x48   : > { %s405_s25 = scalar_lea.vmem [#allocation6], %s5973_s28  ;;  %s6956_s7 = sand.u32 1, %s5779_s22  }
  0x49   : > { %s412_s30 = sshll.u32 %s405_s25, 4  ;;  %s5989_s18 = scalar_lea.sflag [#allocation7], %s6956_s7  ;;  %s5985_s30 = int_to_ptr.vmem [resolvable:$true] %s412_s30 }
  0x4a   : > { %p5995_p0 = pneg %p5968_p9 }
  0x4c   : > { %s6957_s19 = scalar_select %p5995_p0, 1, 0 }
  0x4d   : > { %s5982_s15 = scalar_lea.hbm %s6955_s3, %s5976_s12  ;;  %s5496_s25 = scalar_lea.hbm %s6955_s3, 128 }
  0x4e   : > { %s5491_s21 = scalar_lea.hbm %s5982_s15, 64  ;;  %p5497_p6 = scmp.lt.u32.totalorder %s5982_s15, %s6955_s3 }
  0x4f   : > { %p5492_p12 = scmp.ne.s32.totalorder %s5982_s15, %s5491_s21  ;;  %p5498_p10 = scmp.lt.u32.totalorder %s5496_s25, %s5491_s21 }
  0x50   : > { %p5500_p5 = scmp.lt.u32.totalorder %s5491_s21, %s5982_s15 }
  0x51   : > { %p5494_p1 = pnand %p5995_p0, %p5492_p12  ;;  %p5499_p3 = por %p5498_p10, %p5497_p6 }
  0x53   : > { %p5495_p2 = pneg %p5494_p1  ;;  %p5501_p7 = por %p5500_p5, %p5499_p3 }
  0x55   : > { %p5502_p4 = pnand %p5501_p7, %p5495_p2 }
  0x57   : > { %5505 = shalt.err (!%p5502_p4)
}
  0x58   : > { %s5506_s7 = scalar_lea.vmem %s5985_s30, 64  ;;  %s5784_s13 = smov [#allocation6]  }
  0x59   : > { %p5507_p12 = scmp.ne.s32.totalorder %s5985_s30, %s5506_s7  ;;  %s5511_s17 = sshll.u32 %s5784_s13, 4  ;;  %s5512_s17 = int_to_ptr.vmem [resolvable:$false] %s5511_s17 }
  0x5a   : > { %s5513_s11 = scalar_lea.vmem %s5512_s17, 128  ;;  %p5514_p11 = scmp.lt.s32.totalorder %s5985_s30, %s5512_s17 }
  0x5b   : > { %p5509_p1 = pnand %p5507_p12, %p5995_p0  ;;  %p5515_p13 = scmp.lt.s32.totalorder %s5513_s11, %s5506_s7 }
  0x5d   : > { %p5510_p8 = pneg %p5509_p1  ;;  %p5516_p6 = por %p5515_p13, %p5514_p11 }
  0x5f   : > { %p5517_p10 = pnand %p5516_p6, %p5510_p8 }
  0x61   : > { %5520 = shalt.err (!%p5517_p10)
}
  0x62   : > { %5399 = dma.hbm_to_vmem [thread:$0]  (!%p5968_p9), %s5982_s15, 64, %s5985_s30, %s5989_s18  }
  0x63   : > { %s6958_s5 = sld [smem:[#allocation49_spill]]  ;;  %s441_s7 = scalar_lea.vmem [#allocation9], %s5973_s28 }
  0x64   : > { %s448_s13 = sshll.u32 %s441_s7, 4  ;;  %s5785_s17 = smov [#allocation14]   ;;  %s6026_s13 = int_to_ptr.vmem [resolvable:$true] %s448_s13 }
  0x65   : > { %s6028_s11 = sshll.u32 %s5785_s17, 4  ;;  %s6959_s3 = sand.u32 1, %s5779_s22   ;;  %s355_s11 = int_to_ptr.vmem [resolvable:$true] %s6028_s11 }
  0x66   : > { %s6032_s9 = scalar_lea.sflag [#allocation10], %s6959_s3 }
  0x69   : > { %s6023_s25 = scalar_lea.hbm %s6958_s5, %s5976_s12  ;;  %s5526_s27 = scalar_lea.hbm %s6958_s5, 128 }
  0x6a   : > { %s5521_s30 = scalar_lea.hbm %s6023_s25, 64  ;;  %p5527_p13 = scmp.lt.u32.totalorder %s6023_s25, %s6958_s5 }
  0x6b   : > { %p5522_p4 = scmp.ne.s32.totalorder %s6023_s25, %s5521_s30  ;;  %p5528_p7 = scmp.lt.u32.totalorder %s5526_s27, %s5521_s30 }
  0x6c   : > { %p5530_p3 = scmp.lt.u32.totalorder %s5521_s30, %s6023_s25 }
  0x6d   : > { %p5524_p8 = pnand %p5522_p4, %p5995_p0  ;;  %p5529_p2 = por %p5528_p7, %p5527_p13 }
  0x6f   : > { %p5525_p11 = pneg %p5524_p8  ;;  %p5531_p5 = por %p5530_p3, %p5529_p2 }
  0x71   : > { %p5532_p12 = pnand %p5531_p5, %p5525_p11 }
  0x73   : > { %5535 = shalt.err (!%p5532_p12)
}
  0x74   : > { %s5536_s3 = scalar_lea.vmem %s6026_s13, 64  ;;  %s5786_s7 = smov [#allocation9]  }
  0x75   : > { %p5537_p1 = scmp.ne.s32.totalorder %s6026_s13, %s5536_s3  ;;  %s5541_s17 = sshll.u32 %s5786_s7, 4  ;;  %s5542_s17 = int_to_ptr.vmem [resolvable:$false] %s5541_s17 }
  0x76   : > { %s5543_s0 = scalar_lea.vmem %s5542_s17, 128  ;;  %p5544_p4 = scmp.lt.s32.totalorder %s6026_s13, %s5542_s17 }
  0x77   : > { %p5539_p6 = pnand %p5537_p1, %p5995_p0  ;;  %p5545_p8 = scmp.lt.s32.totalorder %s5543_s0, %s5536_s3 }
  0x79   : > { %p5540_p10 = pneg %p5539_p6  ;;  %p5546_p13 = por %p5545_p8, %p5544_p4 }
  0x7b   : > { %p5547_p7 = pnand %p5546_p13, %p5540_p10 }
  0x7d   : > { %5550 = shalt.err (!%p5547_p7)
}
  0x7e   : > { %5405 = dma.hbm_to_vmem [thread:$0]  (!%p5968_p9), %s6023_s25, 64, %s6026_s13, %s6032_s9  }
  0x7f   : > { %s5551_s15 = scalar_lea.hbm %s6860_s8, 1024  ;;  %p6960_p2 = scmp.ne.s32.totalorder %s6949_s23, 0 }
  0x80   : > { %p5552_p11 = scmp.ne.s32.totalorder %s6860_s8, %s5551_s15  ;;  %p5558_p12 = scmp.lt.u32.totalorder %s5551_s15, %s6860_s8 }
  0x82   : > { %p5554_p3 = pnand %p5552_p11, %p6960_p2 }
  0x84   : > { %p5555_p5 = pneg %p5554_p3 }
  0x86   : > { %p5560_p1 = pnand %p5558_p12, %p5555_p5 }
  0x88   : > { %5563 = shalt.err (!%p5560_p1)
}
  0x89   : > { %s5564_s17 = scalar_lea.vmem %s355_s11, 1024  ;;  %p5572_p8 = scmp.lt.s32.totalorder %s355_s11, %s355_s11 }
  0x8a   : > { %p5565_p6 = scmp.ne.s32.totalorder %s355_s11, %s5564_s17  ;;  %p5573_p13 = scmp.lt.s32.totalorder %s5564_s17, %s5564_s17 }
  0x8c   : > { %p5567_p10 = pnand %p5565_p6, %p6960_p2  ;;  %p5574_p7 = por %p5573_p13, %p5572_p8 }
  0x8e   : > { %p5568_p4 = pneg %p5567_p10 }
  0x90   : > { %p5575_p9 = pnand %p5574_p7, %p5568_p4 }
  0x92   : > { %5578 = shalt.err (!%p5575_p9)
}
  0x93   : > { %p6961_p11 = scmp.ne.s32.totalorder %s6946_s29, 0  ;;  %s6962_s25 = smov 16  }
  0x94   : > { %s6963_s13 = smov 256   ;;  %s5787_s30 = smov [#allocation15]  }
  0x95   : > { %5389 = dma.hbm_to_vmem [thread:$0]  (!%p6961_p11), %s6860_s8, 1024, %s355_s11, [#allocation13], %s6963_s13, %s6963_s13, %s6962_s25  }
  0x96   : > { %s371_s15 = sshll.u32 %s5787_s30, 4  ;;  %s4904_s21 = sshll.u32 %s5965_s14, 3  ;;  %s372_s15 = int_to_ptr.vmem [resolvable:$true] %s371_s15 }
  0x97   : > { %s5579_s7 = scalar_lea.hbm %s6862_s10, 128 }
  0x98   : > { %p5580_p9 = scmp.ne.s32.totalorder %s6862_s10, %s5579_s7  ;;  %p5586_p12 = scmp.lt.u32.totalorder %s5579_s7, %s6862_s10 }
  0x9a   : > { %p5582_p3 = pnand %p5580_p9, %p6960_p2 }
  0x9c   : > { %p5583_p5 = pneg %p5582_p3 }
  0x9e   : > { %p5588_p1 = pnand %p5586_p12, %p5583_p5 }
  0xa0   : > { %5591 = shalt.err (!%p5588_p1)
}
  0xa1   : > { %s5592_s11 = scalar_lea.vmem %s372_s15, 128  ;;  %p5600_p8 = scmp.lt.s32.totalorder %s372_s15, %s372_s15 }
  0xa2   : > { %p5593_p6 = scmp.ne.s32.totalorder %s372_s15, %s5592_s11  ;;  %p5601_p13 = scmp.lt.s32.totalorder %s5592_s11, %s5592_s11 }
  0xa4   : > { %p5595_p10 = pnand %p5593_p6, %p6960_p2  ;;  %p5602_p7 = por %p5601_p13, %p5600_p8 }
  0xa6   : > { %p5596_p4 = pneg %p5595_p10 }
  0xa8   : > { %p5603_p0 = pnand %p5602_p7, %p5596_p4 }
  0xaa   : > { %5606 = shalt.err (!%p5603_p0)
}
  0xab   : > { %5392 = dma.hbm_to_vmem [thread:$0]  (!%p6961_p11), %s6862_s10, 128, %s372_s15, [#allocation16]  }
  0xac   : > { %s4933_s24 = sshll.u32 %s5779_s22, 7  ;;  %s386_s30 = scalar_lea.vmem [#allocation3], %s4904_s21 }
  0xad   : > { %s6101_s23 = scalar_lea.hbm %s6854_s2, %s4933_s24  ;;  %s394_s27 = sshll.u32 %s386_s30, 4  ;;  %s395_s27 = int_to_ptr.vmem [resolvable:$true] %s394_s27 }
  0xae   : > { %s383_s29 = scalar_lea.sflag [#allocation4], %s5965_s14  ;;  %s5607_s3 = scalar_lea.hbm %s6101_s23, 128 }
  0xaf   : > { %p5608_p0 = scmp.ne.s32.totalorder %s6101_s23, %s5607_s3  ;;  %p6964_p2 = scmp.ne.s32.totalorder %s6957_s19, 0 }
  0xb0   : > { %s5612_s17 = scalar_lea.hbm %s6854_s2, 256  ;;  %p5613_p11 = scmp.lt.u32.totalorder %s6101_s23, %s6854_s2 }
  0xb1   : > { %p5610_p9 = pnand %p5608_p0, %p6964_p2  ;;  %p5614_p5 = scmp.lt.u32.totalorder %s5612_s17, %s5607_s3 }
  0xb2   : > { %p5616_p1 = scmp.lt.u32.totalorder %s5607_s3, %s6101_s23 }
  0xb3   : > { %p5611_p3 = pneg %p5610_p9  ;;  %p5615_p12 = por %p5614_p5, %p5613_p11 }
  0xb5   : > { %p5617_p6 = por %p5616_p1, %p5615_p12 }
  0xb7   : > { %p5618_p10 = pnand %p5617_p6, %p5611_p3 }
  0xb9   : > { %5621 = shalt.err (!%p5618_p10)
}
  0xba   : > { %s5622_s14 = scalar_lea.vmem %s395_s27, 128  ;;  %s5788_s21 = smov [#allocation3]  }
  0xbb   : > { %p5623_p4 = scmp.ne.s32.totalorder %s395_s27, %s5622_s14  ;;  %s5627_s5 = sshll.u32 %s5788_s21, 4  ;;  %s5628_s5 = int_to_ptr.vmem [resolvable:$false] %s5627_s5 }
  0xbc   : > { %s5629_s25 = scalar_lea.vmem %s5628_s5, 256  ;;  %p5630_p7 = scmp.lt.s32.totalorder %s395_s27, %s5628_s5 }
  0xbd   : > { %p5625_p8 = pnand %p5623_p4, %p6964_p2  ;;  %p5631_p0 = scmp.lt.s32.totalorder %s5629_s25, %s5622_s14 }
  0xbf   : > { %p5626_p13 = pneg %p5625_p8  ;;  %p5632_p9 = por %p5631_p0, %p5630_p7 }
  0xc1   : > { %p5633_p5 = pnand %p5632_p9, %p5626_p13 }
  0xc3   : > { %5636 = shalt.err (!%p5633_p5)
}
  0xc4   : > { %p6965_p11 = scmp.ne.s32.totalorder %s6954_s16, 0  ;;  %s6125_s1 = scalar_lea.hbm %s6856_s4, %s5976_s12 }
  0xc5   : > { %s423_s30 = scalar_lea.vmem [#allocation8], %s5973_s28  ;;  %s5637_s15 = scalar_lea.hbm %s6125_s1, 64 }
  0xc6   : > { %5396 = dma.hbm_to_vmem [thread:$0]  (!%p6965_p11), %s6101_s23, 128, %s395_s27, %s383_s29  }
  0xc7   : > { %s430_s3 = sshll.u32 %s423_s30, 4  ;;  %p5638_p3 = scmp.ne.s32.totalorder %s6125_s1, %s5637_s15  ;;  %s431_s3 = int_to_ptr.vmem [resolvable:$true] %s430_s3 }
  0xc8   : > { %s5642_s23 = scalar_lea.hbm %s6856_s4, 128  ;;  %p5643_p6 = scmp.lt.u32.totalorder %s6125_s1, %s6856_s4 }
  0xc9   : > { %p5640_p12 = pnand %p5638_p3, %p6964_p2  ;;  %p5644_p10 = scmp.lt.u32.totalorder %s5642_s23, %s5637_s15 }
  0xca   : > { %p5646_p8 = scmp.lt.u32.totalorder %s5637_s15, %s6125_s1 }
  0xcb   : > { %p5641_p1 = pneg %p5640_p12  ;;  %p5645_p4 = por %p5644_p10, %p5643_p6 }
  0xcd   : > { %p5647_p13 = por %p5646_p8, %p5645_p4 }
  0xcf   : > { %p5648_p7 = pnand %p5647_p13, %p5641_p1 }
  0xd1   : > { %5651 = shalt.err (!%p5648_p7)
}
  0xd2   : > { %s5652_s0 = scalar_lea.vmem %s431_s3, 64  ;;  %s5789_s11 = smov [#allocation8]  }
  0xd3   : > { %p5653_p0 = scmp.ne.s32.totalorder %s431_s3, %s5652_s0  ;;  %s5657_s14 = sshll.u32 %s5789_s11, 4  ;;  %s5658_s14 = int_to_ptr.vmem [resolvable:$false] %s5657_s14 }
  0xd4   : > { %s5659_s21 = scalar_lea.vmem %s5658_s14, 128  ;;  %p5660_p3 = scmp.lt.s32.totalorder %s431_s3, %s5658_s14 }
  0xd5   : > { %p5655_p9 = pnand %p5653_p0, %p6964_p2  ;;  %p5661_p12 = scmp.lt.s32.totalorder %s5659_s21, %s5652_s0 }
  0xd7   : > { %p5656_p5 = pneg %p5655_p9  ;;  %p5662_p11 = por %p5661_p12, %p5660_p3 }
  0xd9   : > { %p5663_p6 = pnand %p5662_p11, %p5656_p5 }
  0xdb   : > { %5666 = shalt.err (!%p5663_p6)
}
  0xdc   : > { %p6966_p10 = scmp.ne.s32.totalorder %s6954_s16, 0  ;;  %s6150_s24 = scalar_lea.hbm %s6858_s6, %s5976_s12 }
  0xdd   : > { %s459_s13 = scalar_lea.vmem [#allocation11], %s5973_s28  ;;  %s5667_s15 = scalar_lea.hbm %s6150_s24, 64 }
  0xde   : > { %5402 = dma.hbm_to_vmem [thread:$0]  (!%p6966_p10), %s6125_s1, 64, %s431_s3, %s5989_s18  }
  0xdf   : > { %s466_s30 = sshll.u32 %s459_s13, 4  ;;  %p5668_p11 = scmp.ne.s32.totalorder %s6150_s24, %s5667_s15  ;;  %s467_s30 = int_to_ptr.vmem [resolvable:$true] %s466_s30 }
  0xe0   : > { %s5672_s18 = scalar_lea.hbm %s6858_s6, 128  ;;  %p5673_p8 = scmp.lt.u32.totalorder %s6150_s24, %s6858_s6 }
  0xe1   : > { %p5670_p1 = pnand %p5668_p11, %p6964_p2  ;;  %p5674_p13 = scmp.lt.u32.totalorder %s5672_s18, %s5667_s15 }
  0xe2   : > { %p5676_p0 = scmp.lt.u32.totalorder %s5667_s15, %s6150_s24 }
  0xe3   : > { %p5671_p4 = pneg %p5670_p1  ;;  %p5675_p7 = por %p5674_p13, %p5673_p8 }
  0xe5   : > { %p5677_p9 = por %p5676_p0, %p5675_p7 }
  0xe7   : > { %p5678_p5 = pnand %p5677_p9, %p5671_p4 }
  0xe9   : > { %5681 = shalt.err (!%p5678_p5)
}
  0xea   : > { %s5682_s28 = scalar_lea.vmem %s467_s30, 64  ;;  %s5790_s12 = smov [#allocation11]  }
  0xeb   : > { %p5683_p3 = scmp.ne.s32.totalorder %s467_s30, %s5682_s28  ;;  %s5687_s23 = sshll.u32 %s5790_s12, 4  ;;  %s5688_s23 = int_to_ptr.vmem [resolvable:$false] %s5687_s23 }
  0xec   : > { %s5689_s27 = scalar_lea.vmem %s5688_s23, 128  ;;  %p5690_p11 = scmp.lt.s32.totalorder %s467_s30, %s5688_s23 }
  0xed   : > { %p5685_p12 = pnand %p5683_p3, %p6964_p2  ;;  %p5691_p1 = scmp.lt.s32.totalorder %s5689_s27, %s5682_s28 }
  0xef   : > { %p5686_p6 = pneg %p5685_p12  ;;  %p5692_p10 = por %p5691_p1, %p5690_p11 }
  0xf1   : > { %p5693_p8 = pnand %p5692_p10, %p5686_p6 }
  0xf3   : > { %5696 = shalt.err (!%p5693_p8)
}
  0xf4   : > { %p6967_p13 = scmp.ne.s32.totalorder %s6954_s16, 0  ;;  %p6968_p4 = scmp.ne.s32.totalorder %s6945_s26, 0 }
  0xf6   : > { %5408 = dma.hbm_to_vmem [thread:$0]  (!%p6967_p13), %s6150_s24, 64, %s467_s30, %s6032_s9  }
  0xf7   : > { %475 = sbr.rel (%p6968_p4) target bundleno = 1234 (0x4d2), region = 64 }
  0xfe   : > { %s6969_s19 = sld [smem:[#allocation27_spill]]  ;;  %s6174_s29 = sand.u32 1, %s5771_s20  }
  0xff   : > { %s4916_s0 = sshll.u32 %s6174_s29, 3  ;;  %s478_s11 = scalar_lea.sflag [#allocation4], %s6174_s29 }
 0x100   : > { %s6178_s14 = scalar_lea.vmem [#allocation3], %s4916_s0 }
 0x104   : > { %p6970_p2 = scmp.ne.s32.totalorder %s6969_s19, 0 }
 0x106   : > { %5742 = dma.done.wait (%p6970_p2), %s478_s11, 128  }
 0x107   : > { %5744 = vsyncadd (%p6970_p2), %s478_s11, 4294967168  ;;  %s6971_s16 = sld [smem:[#allocation26_spill]]  ;;  %s6186_s26 = sshll.u32 %s6174_s29, 2 }
 0x108   : > { %s490_s5 = scalar_lea.vmem [#allocation6], %s6186_s26 }
 0x10d   : > { %s486_s9 = sand.u32 1, %s6971_s16  }
 0x10e   : > { %s487_s21 = scalar_lea.sflag [#allocation7], %s486_s9 }
 0x10f   : > { %5746 = dma.done.wait (%p6970_p2), %s487_s21, 128  }
 0x110   : > { %5748 = vsyncadd (%p6970_p2), %s487_s21, 4294967168  ;;  %s499_s25 = scalar_lea.vmem [#allocation8], %s6186_s26  ;;  %s505_s24 = scalar_lea.sflag [#allocation10], %s486_s9 }
 0x111   : > { %s508_s13 = scalar_lea.vmem [#allocation9], %s6186_s26 }
 0x112   : > { %5750 = dma.done.wait (%p6970_p2), %s505_s24, 128  }
 0x113   : > { %5752 = vsyncadd (%p6970_p2), %s505_s24, 4294967168  ;;  %s517_s30 = scalar_lea.vmem [#allocation11], %s6186_s26  ;;  %p6972_p10 = scmp.eq.s32.totalorder %s6971_s16, 0 }
 0x115   : > { %5754 = dma.done.wait (%p6972_p10), [#allocation13], 3072   ;;  %p6973_p7 = pmov %p6972_p10 }
 0x117   : > { %5756 = vsyncadd (%p6973_p7), [#allocation13], 4294964224  ;;  %p6974_p0 = pmov %p6973_p7 }
 0x119   : > { %5758 = dma.done.wait (%p6974_p0), [#allocation16], 128   ;;  %p6975_p9 = pmov %p6974_p0 }
 0x11a   : > { %v6891_v0 = vmov 0.0   ;;  %vm5792_vm0 = vmmov 0   ;;  %vm595_vm1 = vcmask 1043456   ;;  %vm591_vm2 = vcmask 31744   ;;  %v590_v1 = vld [vmem:[%s490_s5] sm:$0xf] }
 0x11b   : > { %5760 = vsyncadd (%p6975_p9), [#allocation16], 4294967168  ;;  %4983 = vmatprep.subr.mxu0 %v6891_v0  ;;  %4985 = vmatprep.mubr.msk.f32.mxu0 %vm5792_vm0, %v6891_v0  ;;  %s6976_s17 = sld [smem:[#allocation47_spill]]  ;;  %v597_v3 = vsel %vm595_vm1, %v590_v1, 0  ;;  %v1046_v5 = vld [vmem:[#allocation12 + $0x8] sm:$0xff]  ;;  %v1048_v6 = vld [vmem:[#allocation12 + $0x18] sm:$0xff] }
 0x11c   : > { %1146 = vmatprep.mubr.f32.mxu1 %v6891_v0  ;;  %v1045_v7 = vld [vmem:[#allocation12] sm:$0xff]  ;;  %v600_v8 = vand.u32 4294901760, %v597_v3  ;;  %v1066_v10 = vand.u32 4294901760, %v1046_v5  ;;  %v1047_v11 = vld [vmem:[#allocation12 + $0x10] sm:$0xff]  ;;  %v1050_v12 = vld [vmem:[#allocation12 + $0x28] sm:$0xff]  ;;  %v1070_v13 = vand.u32 4294901760, %v1048_v6 }
 0x11d   : > { %v1068_v14 = vand.u32 4294901760, %v1045_v7  ;;  %v1072_v15 = vand.u32 4294901760, %v1047_v11  ;;  %v1052_v19 = vld [vmem:[#allocation12 + $0x38] sm:$0xff]  ;;  %v1074_v20 = vand.u32 4294901760, %v1050_v12  ;;  %v1737_v36 = vld [vmem:[%s499_s25] sm:$0xf] }
 0x11e   : > { %4984 = vmatpush3.msra.mxu0 %v600_v8  ;;  %v677_v16 = vsub.f32 %v597_v3, %v600_v8  ;;  %v6222_v18 = vsub.f32 %v1046_v5, %v1066_v10  ;;  %v6225_v21 = vpack.c.bf16 %v1070_v13, %v1066_v10  ;;  %v6227_v22 = vsub.f32 %v1048_v6, %v1070_v13  ;;  %v1049_v43 = vld [vmem:[#allocation12 + $0x20] sm:$0xff]  ;;  %v1051_v44 = vld [vmem:[#allocation12 + $0x30] sm:$0xff]  ;;  %v1054_v48 = vld [vmem:[#allocation12 + $0x48] sm:$0xff]  ;;  %s7036_s3 = sld [smem:[#allocation51_spill]]  ;;  %s589_s11 = sld [smem:[#allocation2]] }
 0x11f   : > { %4988 = vmatprep.subr.mxu0 %v6891_v0  ;;  %v6229_v23 = vpack.c.bf16 %v1072_v15, %v1068_v14  ;;  %v6231_v24 = vsub.f32 %v1045_v7, %v1068_v14  ;;  %v6236_v27 = vsub.f32 %v1047_v11, %v1072_v15  ;;  %v1078_v28 = vand.u32 4294901760, %v1052_v19  ;;  %v1056_v49 = vld [vmem:[#allocation12 + $0x58] sm:$0xff]  ;;  %v1053_v52 = vld [vmem:[#allocation12 + $0x40] sm:$0xff]  ;;  %v1055_v53 = vld [vmem:[#allocation12 + $0x50] sm:$0xff]  ;;  %s4924_s9 = sshll.u32 %s6174_s29, 4  ;;  %s4934_s21 = sshll.u32 %s6971_s16, 8 }
 0x120   : > { %v678_v26 = vand.u32 4294901760, %v677_v16  ;;  %5104 = vmatprep.subr.bf16.mxu1 %v6225_v21  ;;  %v6239_v29 = vsub.f32 %v1050_v12, %v1074_v20  ;;  %v1739_v37 = vsel %vm595_vm1, %v1737_v36, 0  ;;  %v1076_v45 = vand.u32 4294901760, %v1049_v43  ;;  %v1058_v58 = vld [vmem:[#allocation12 + $0x68] sm:$0xff]  ;;  %v1060_v59 = vld [vmem:[#allocation12 + $0x78] sm:$0xff]  ;;  %v1057_v62 = vld [vmem:[#allocation12 + $0x60] sm:$0xff] }
 0x121   : > { %v588_v2 = vld [vmem:[%s6976_s17] sm:$0x1]  ;;  %5106 = vmatpush1.bf16.msra.mxu1 %v6229_v23  ;;  %v6244_v32 = vpack.c.bf16 %v1078_v28, %v1074_v20  ;;  %v6246_v33 = vsub.f32 %v1052_v19, %v1078_v28  ;;  %v1742_v38 = vand.u32 4294901760, %v1739_v37  ;;  %v1080_v46 = vand.u32 4294901760, %v1051_v44  ;;  %s6758_s26 = scalar_lea.vmem [#allocation17], %s4924_s9  ;;  %s4699_s15 = scalar_lea.sflag [#allocation5], %s6174_s29 }
 0x122   : > { %v593_v4 = vsel %vm591_vm2, %v588_v2, 0  ;;  %v679_v31 = vsub.f32 %v677_v16, %v678_v26  ;;  %v1082_v50 = vand.u32 4294901760, %v1054_v48  ;;  %v1086_v51 = vand.u32 4294901760, %v1056_v49  ;;  %v1059_v63 = vld [vmem:[#allocation12 + $0x70] sm:$0xff]  ;;  %s4713_s5 = sshll.u32 %s6758_s26, 4  ;;  %s5794_s7 = smov [#allocation17]   ;;  %s6807_s5 = int_to_ptr.vmem [resolvable:$true] %s4713_s5 }
 0x123   : > { %v6217_v9 = vand.u32 4294901760, %v593_v4  ;;  %5108 = vmatprep.subr.bf16.mxu1 %v6244_v32  ;;  %v1819_v39 = vsub.f32 %v1739_v37, %v1742_v38  ;;  %v6299_v47 = vpack.c.bf16 %v1080_v46, %v1076_v45  ;;  %v1084_v54 = vand.u32 4294901760, %v1053_v52  ;;  %s5697_s16 = scalar_lea.vmem %s6807_s5, 256  ;;  %s5701_s17 = sshll.u32 %s5794_s7, 4  ;;  %s5702_s17 = int_to_ptr.vmem [resolvable:$false] %s5701_s17 }
 0x124   : > { %v680_v35 = vand.u32 4294901760, %v679_v31  ;;  %v1088_v55 = vand.u32 4294901760, %v1055_v53  ;;  %v6302_v56 = vpack.c.bf16 %v1086_v51, %v1082_v50  ;;  %v1090_v60 = vand.u32 4294901760, %v1058_v58  ;;  %p5698_p5 = scmp.ne.s32.totalorder %s6807_s5, %s5697_s16  ;;  %s5703_s18 = scalar_lea.vmem %s5702_s17, 512 }
 0x125   : > { %6977 = vst [vmem:[#allocation32_spill] sm:$0xff] %v6217_v9  ;;  %v6220_v17 = vsub.f32 %v593_v4, %v6217_v9  ;;  %v1820_v40 = vand.u32 4294901760, %v1819_v39  ;;  %5110 = vmatpush1.bf16.msra.mxu1 %v6299_v47  ;;  %v1094_v61 = vand.u32 4294901760, %v1060_v59  ;;  %v6908_v1 = vand.u32 4294901760, %v6222_v18  ;;  %p5704_p11 = scmp.lt.s32.totalorder %s6807_s5, %s5702_s17  ;;  %p5705_p1 = scmp.lt.s32.totalorder %s5703_s18, %s5697_s16 }
 0x126   : > { %v6304_v57 = vpack.c.bf16 %v1088_v55, %v1084_v54  ;;  %5112 = vmatprep.subr.bf16.mxu1 %v6302_v56  ;;  %v6907_v2 = vand.u32 4294901760, %v6227_v22  ;;  %v1092_v3 = vand.u32 4294901760, %v1057_v62  ;;  %v1096_v4 = vand.u32 4294901760, %v1059_v63 }
 0x127   : > { %6978 = vst [vmem:[#allocation33_spill] sm:$0xff] %v6220_v17  ;;  %v6234_v25 = vand.u32 4294901760, %v6220_v17  ;;  %v1821_v41 = vsub.f32 %v1819_v39, %v1820_v40  ;;  %v6906_v5 = vand.u32 4294901760, %v6231_v24  ;;  %v6311_v6 = vpack.c.bf16 %v1094_v61, %v1090_v60  ;;  %p5706_p8 = por %p5705_p1, %p5704_p11 }
 0x128   : > { %v1161_v7 = vsub.f32 %v6222_v18, %v6908_v1  ;;  %v6905_v10 = vand.u32 4294901760, %v6236_v27  ;;  %v6320_v11 = vsub.f32 %v1049_v43, %v1076_v45  ;;  %v6322_v12 = vsub.f32 %v1051_v44, %v1080_v46 }
 0x129   : > { %6979 = vst [vmem:[#allocation34_spill] sm:$0xff] %v6234_v25  ;;  %v668_v30 = vsub.f32 %v6220_v17, %v6234_v25  ;;  %v1822_v42 = vand.u32 4294901760, %v1821_v41  ;;  %5114 = vmatpush1.bf16.msra.mxu1 %v6304_v57  ;;  %6981 = vst [vmem:[#allocation36_spill] sm:$0xff] %v6311_v6  ;;  %v6324_v13 = vsub.f32 %v1054_v48, %v1082_v50  ;;  %vm2199_vm3 = vcmask 1040384  }
 0x12a   : > { %v6326_v14 = vsub.f32 %v1056_v49, %v1086_v51  ;;  %v6328_v15 = vsub.f32 %v1053_v52, %v1084_v54  ;;  %5116 = vmatprep.subr.bf16.mxu1 %v6311_v6  ;;  %v6333_v19 = vsub.f32 %v1058_v58, %v1090_v60  ;;  %v6335_v20 = vsub.f32 %v1060_v59, %v1094_v61 }
 0x12b   : > { %v6248_v34 = vand.u32 4294901760, %v668_v30  ;;  %v6339_v28 = vsub.f32 %v1057_v62, %v1092_v3  ;;  %v6341_v30 = vsub.f32 %v1059_v63, %v1096_v4  ;;  %v1162_v31 = vand.u32 4294901760, %v1161_v7 }
 0x12c   : > { %v1167_v36 = vsub.f32 %v6231_v24, %v6906_v5  ;;  %v1179_v37 = vsub.f32 %v6236_v27, %v6905_v10  ;;  %v6901_v41 = vand.u32 4294901760, %v6322_v12  ;;  %v6900_v50 = vand.u32 4294901760, %v6324_v13 }
 0x12d   : > { %6980 = vst [vmem:[#allocation35_spill] sm:$0xff] %v6248_v34  ;;  %4986 = vmatmul.mubr.f32.vlgmr.msra.gmra.mrb[0].mxu0 %v6248_v34  ;;  %v6898_v54 = vand.u32 4294901760, %v6328_v15  ;;  %vm1062_vm4 = vcmask 523264   ;;  %vm2195_vm5 = vcmask 203776   ;;  %vm3224_vm7 = vcmask 72704  }
 0x12e   : > { %4989 = vmatpush3.msra.mxu0 %v680_v35  ;;  %4990 = vmatprep.mubr.msk.f32.mxu0 %vm5792_vm0, %v6891_v0  ;;  %v1168_v43 = vand.u32 4294901760, %v1167_v36  ;;  %v1180_v44 = vand.u32 4294901760, %v1179_v37  ;;  %v1203_v49 = vsub.f32 %v6322_v12, %v6901_v41  ;;  %v1209_v60 = vsub.f32 %v6324_v13, %v6900_v50 }
 0x12f   : > { %4993 = vmatprep.subr.mxu0 %v6891_v0  ;;  %v1215_v62 = vsub.f32 %v6328_v15, %v6898_v54  ;;  %v6895_v37 = vand.u32 4294901760, %v6335_v20 }
 0x130   : > { %v6367_v51 = vpack.c.bf16 %v1180_v44, %v1168_v43  ;;  %v1204_v59 = vand.u32 4294901760, %v1203_v49  ;;  %v1210_v7 = vand.u32 4294901760, %v1209_v60  ;;  %v6894_v43 = vand.u32 4294901760, %v6339_v28 }
 0x131   : > { %v6893_v44 = vand.u32 4294901760, %v6341_v30 }
 0x135   : > { %4991 = vmatmul.mubr.f32.vlgmr.msra.gmra.mrb[0].mxu0 %v6217_v9 }
 0x136   : > { %4994 = vmatpush3.msra.mxu0 %v677_v16  ;;  %4995 = vmatprep.mubr.msk.f32.mxu0 %vm5792_vm0, %v6891_v0  ;;  %v6330_v16 = vsub.f32 %v1055_v53, %v1088_v55  ;;  %v6899_v53 = vand.u32 4294901760, %v6326_v14 }
 0x137   : > { %4998 = vmatprep.subr.mxu0 %v6891_v0 }
 0x138   : > { %v1221_v61 = vsub.f32 %v6326_v14, %v6899_v53  ;;  %v6897_v63 = vand.u32 4294901760, %v6330_v16 }
 0x13a   : > { %v1227_v36 = vsub.f32 %v6330_v16, %v6897_v63  ;;  %v2193_v63 = vld [vmem:[#allocation14 + $0x30] sm:$0x1] }
 0x13d   : > { %4996 = vmatmul.mubr.f32.vlgmr.msra.gmra.mrb[0].mxu0 %v6220_v17 }
 0x13e   : > { %4999 = vmatpush3.msra.mxu0 %v600_v8  ;;  %5000 = vmatprep.mubr.msk.f32.mxu0 %vm5792_vm0, %v6891_v0 }
 0x13f   : > { %5003 = vmatprep.subr.mxu0 %v6891_v0 }
 0x145   : > { %5001 = vmatmul.mubr.f32.vlgmr.msra.gmra.mrb[0].mxu0 %v6234_v25 }
 0x146   : > { %5004 = vmatpush3.msra.mxu0 %v678_v26  ;;  %5005 = vmatprep.mubr.msk.f32.mxu0 %vm5792_vm0, %v6891_v0  ;;  %v6337_v26 = vpack.c.bf16 %v1096_v4, %v1092_v3 }
 0x147   : > { %5008 = vmatprep.subr.mxu0 %v6891_v0 }
 0x148   : > { %6982 = vst [vmem:[#allocation37_spill] sm:$0xff] %v6337_v26  ;;  %5118 = vmatpush1.bf16.msra.mxu1 %v6337_v26 }
 0x14d   : > { %5006 = vmatmul.mubr.f32.vlgmr.msra.gmra.mrb[0].mxu0 %v6217_v9 }
 0x14e   : > { %5009 = vmatpush3.msra.mxu0 %v600_v8  ;;  %5010 = vmatprep.mubr.msk.f32.mxu0 %vm5792_vm0, %v6891_v0  ;;  %v1173_v8 = vsub.f32 %v6227_v22, %v6907_v2 }
 0x14f   : > { %5013 = vmatprep.subr.mxu0 %v6891_v0 }
 0x150   : > { %v1174_v35 = vand.u32 4294901760, %v1173_v8  ;;  %v6896_v8 = vand.u32 4294901760, %v6333_v19 }
 0x155   : > { %5011 = vmatmul.mubr.f32.vlgmr.msra.gmra.mrb[0].mxu0 %v6217_v9 }
 0x156   : > { %5014 = vmatpush3.msra.mxu0 %v1742_v38  ;;  %5015 = vmatprep.mubr.msk.f32.mxu0 %vm5792_vm0, %v6891_v0 }
 0x157   : > { %5018 = vmatprep.subr.mxu0 %v6891_v0 }
 0x159   : > { %5016 = vmatmul.mubr.f32.vlgmr.msra.gmra.mrb[2].mxu0 %v6248_v34  ;;  %v6990_v34 = vand.u32 4294901760, %v6222_v18 }
 0x15a   : > { %5019 = vmatpush3.msra.mxu0 %v1822_v42  ;;  %5020 = vmatprep.mubr.msk.f32.mxu0 %vm5792_vm0, %v6891_v0  ;;  %v5119_v42 = vpack.c.bf16 %v1174_v35, %v1162_v31  ;;  %v1222_v31 = vand.u32 4294901760, %v1221_v61  ;;  %v1216_v35 = vand.u32 4294901760, %v1215_v62 }
 0x15b   : > { %5023 = vmatprep.subr.mxu0 %v6891_v0 }
 0x15c   : > { %5120 = vmatprep.subr.bf16.mxu1 %v5119_v42  ;;  %v1233_v42 = vsub.f32 %v6333_v19, %v6896_v8 }
 0x15e   : > { %v1234_v49 = vand.u32 4294901760, %v1233_v42  ;;  %v2187_v42 = vld [vmem:[#allocation14] sm:$0xff] }
 0x161   : > { %5021 = vmatmul.mubr.f32.vlgmr.msra.gmra.mrb[2].mxu0 %v6217_v9 }
 0x162   : > { %5024 = vmatpush3.msra.mxu0 %v1819_v39  ;;  %5025 = vmatprep.mubr.msk.f32.mxu0 %vm5792_vm0, %v6891_v0  ;;  %v6903_v39 = vand.u32 4294901760, %v6246_v33 }
 0x163   : > { %5028 = vmatprep.subr.mxu0 %v6891_v0 }
 0x164   : > { %v1197_v46 = vsub.f32 %v6246_v33, %v6903_v39 }
 0x166   : > { %v1198_v55 = vand.u32 4294901760, %v1197_v46  ;;  %v1228_v46 = vand.u32 4294901760, %v1227_v36  ;;  %v2189_v36 = vld [vmem:[#allocation14 + $0x10] sm:$0xff] }
 0x169   : > { %5026 = vmatmul.mubr.f32.vlgmr.msra.gmra.mrb[2].mxu0 %v6220_v17 }
 0x16a   : > { %5029 = vmatpush3.msra.mxu0 %v1742_v38  ;;  %5030 = vmatprep.mubr.msk.f32.mxu0 %vm5792_vm0, %v6891_v0 }
 0x16b   : > { %5033 = vmatprep.subr.mxu0 %v6891_v0 }
 0x171   : > { %5031 = vmatmul.mubr.f32.vlgmr.msra.gmra.mrb[2].mxu0 %v6234_v25 }
 0x172   : > { %5034 = vmatpush3.msra.mxu0 %v1820_v40  ;;  %5035 = vmatprep.mubr.msk.f32.mxu0 %vm5792_vm0, %v6891_v0  ;;  %v6902_v40 = vand.u32 4294901760, %v6320_v11 }
 0x173   : > { %5038 = vmatprep.subr.mxu0 %v6891_v0 }
 0x174   : > { %v1191_v48 = vsub.f32 %v6320_v11, %v6902_v40 }
 0x176   : > { %v1192_v58 = vand.u32 4294901760, %v1191_v48  ;;  %v1245_v48 = vsub.f32 %v6335_v20, %v6895_v37  ;;  %v2192_v37 = vld [vmem:[#allocation14 + $0x28] sm:$0xff] }
 0x177   : > { %v2214_v54 = vand.u32 4294901760, %v2192_v37 }
 0x178   : > { %v6383_v4 = vpack.c.bf16 %v1204_v59, %v1192_v58  ;;  %v6406_v58 = vpack.c.bf16 %v1228_v46, %v1216_v35  ;;  %v1246_v59 = vand.u32 4294901760, %v1245_v48  ;;  %v2212_v35 = vand.u32 4294901760, %v2189_v36  ;;  %v2194_v48 = vld [vmem:[#allocation14 + $0x38] sm:$0x1] }
 0x179   : > { %5036 = vmatmul.mubr.f32.vlgmr.msra.gmra.mrb[2].mxu0 %v6217_v9  ;;  %v2204_v8 = vsel %vm2199_vm3, %v2194_v48, 0  ;;  %v6449_v48 = vsub.f32 %v2192_v37, %v2214_v54 }
 0x17a   : > { %5039 = vmatpush3.msra.mxu0 %v1742_v38  ;;  %5040 = vmatprep.mubr.msk.f32.mxu0 %vm5792_vm0, %v6891_v0  ;;  %v6904_v38 = vand.u32 4294901760, %v6239_v29  ;;  %v6408_v62 = vpack.c.bf16 %v1246_v59, %v1234_v49  ;;  %v2190_v59 = vld [vmem:[#allocation14 + $0x18] sm:$0xff]  ;;  %v2218_v53 = vand.u32 4294901760, %v2204_v8 }
 0x17b   : > { %6986 = vst [vmem:[#allocation41_spill] sm:$0xff] %v6449_v48 }
 0x17c   : > { %v1185_v45 = vsub.f32 %v6239_v29, %v6904_v38  ;;  %v6451_v50 = vsub.f32 %v2204_v8, %v2218_v53 }
 0x17e   : > { %v1186_v52 = vand.u32 4294901760, %v1185_v45  ;;  %v6395_v45 = vpack.c.bf16 %v1222_v31, %v1210_v7  ;;  %v2208_v31 = vand.u32 4294901760, %v2187_v42  ;;  %v2328_v37 = vand.u32 4294901760, %v6451_v50 }
 0x180   : > { %v6381_v3 = vpack.c.bf16 %v1198_v55, %v1186_v52  ;;  %v1239_v52 = vsub.f32 %v6339_v28, %v6894_v43  ;;  %v1251_v55 = vsub.f32 %v6341_v30, %v6893_v44  ;;  %v6434_v49 = vpack.c.bf16 %v2212_v35, %v2208_v31 }
 0x181   : > { %5041 = vmatmul.mubr.f32.vlgmr.msra.gmra.mrb[2].mxu0 %v6217_v9  ;;  %v6436_v43 = vsub.f32 %v2187_v42, %v2208_v31  ;;  %v2329_v1 = vsub.f32 %v6451_v50, %v2328_v37 }
 0x182   : > { %2278 = vmatprep.mubr.f32.mxu0 %v6891_v0  ;;  %v1240_v60 = vand.u32 4294901760, %v1239_v52  ;;  %v1252_v61 = vand.u32 4294901760, %v1251_v55  ;;  %v2188_v55 = vld [vmem:[#allocation14 + $0x8] sm:$0xff]  ;;  %6984 = vst [vmem:[#allocation39_spill] sm:$0xff] %v6434_v49  ;;  %v6438_v52 = vsub.f32 %v2189_v36, %v2212_v35  ;;  %v6447_v35 = vpack.c.bf16 %v2218_v53, %v2214_v54 }
 0x183   : > { %v2298_v42 = vand.u32 4294901760, %v6436_v43  ;;  %v2316_v53 = vand.u32 4294901760, %v6449_v48 }
 0x184   : > { %v6410_v7 = vpack.c.bf16 %v1252_v61, %v1240_v60  ;;  %v2206_v60 = vand.u32 4294901760, %v2188_v55  ;;  %v2210_v61 = vand.u32 4294901760, %v2190_v59  ;;  %6985 = vst [vmem:[#allocation40_spill] sm:$0xff] %v6447_v35  ;;  %v2310_v54 = vand.u32 4294901760, %v6438_v52 }
 0x185   : > { %v2299_v5 = vsub.f32 %v6436_v43, %v2298_v42 }
 0x186   : > { %v6428_v0 = vpack.c.bf16 %v2210_v61, %v2206_v60  ;;  %v6430_v46 = vsub.f32 %v2188_v55, %v2206_v60  ;;  %v6432_v44 = vsub.f32 %v2190_v59, %v2210_v61  ;;  %v2191_v55 = vld [vmem:[#allocation14 + $0x20] sm:$0xff]  ;;  %v2201_v59 = vsel %vm2199_vm3, %v2193_v63, 0 }
 0x187   : > { %v2216_v61 = vand.u32 4294901760, %v2191_v55  ;;  %v2220_v31 = vand.u32 4294901760, %v2201_v59 }
 0x188   : > { %6983 = vst [vmem:[#allocation38_spill] sm:$0xff] %v6428_v0  ;;  %5200 = vmatprep.subr.bf16.mxu0 %v6428_v0  ;;  %v2292_v60 = vand.u32 4294901760, %v6430_v46  ;;  %v2304_v36 = vand.u32 4294901760, %v6432_v44 }
 0x189   : > { %5202 = vmatpush1.bf16.msra.mxu0 %v6434_v49  ;;  %v6454_v40 = vpack.c.bf16 %v2220_v31, %v2216_v61  ;;  %v6456_v63 = vsub.f32 %v2191_v55, %v2216_v61  ;;  %v6458_v39 = vsub.f32 %v2201_v59, %v2220_v31  ;;  %v2300_v61 = vand.u32 4294901760, %v2299_v5 }
 0x18a   : > { %v2293_v41 = vsub.f32 %v6430_v46, %v2292_v60  ;;  %v2305_v38 = vsub.f32 %v6432_v44, %v2304_v36  ;;  %5204 = vmatprep.subr.bf16.mxu0 %v6447_v35  ;;  %v2311_v31 = vsub.f32 %v6438_v52, %v2310_v54  ;;  %v2330_v5 = vand.u32 4294901760, %v2329_v1 }
 0x18b   : > { %6987 = vst [vmem:[#allocation42_spill] sm:$0xff] %v6454_v40  ;;  %6988 = vst [vmem:[#allocation43_spill] sm:$0xff] %v6456_v63  ;;  %v2322_v55 = vand.u32 4294901760, %v6456_v63  ;;  %v2334_v59 = vand.u32 4294901760, %v6458_v39 }
 0x18c   : > { %6989 = vst [vmem:[#allocation44_spill] sm:$0xff] %v6458_v39  ;;  %v2294_v10 = vand.u32 4294901760, %v2293_v41  ;;  %v2306_v8 = vand.u32 4294901760, %v2305_v38  ;;  %v2317_v41 = vsub.f32 %v6449_v48, %v2316_v53  ;;  %v2312_v9 = vand.u32 4294901760, %v2311_v31 }
 0x18d   : > { %5206 = vmatpush1.bf16.msra.mxu0 %v6454_v40  ;;  %v2323_v25 = vsub.f32 %v6456_v63, %v2322_v55  ;;  %v2335_v17 = vsub.f32 %v6458_v39, %v2334_v59  ;;  %v6991_v40 = vand.u32 4294901760, %v6227_v22  ;;  %v6538_v48 = vpack.c.bf16 %v2310_v54, %v2298_v42 }
 0x18e   : > { %v5207_v2 = vpack.c.bf16 %v2306_v8, %v2294_v10  ;;  %v2318_v38 = vand.u32 4294901760, %v2317_v41  ;;  %v6480_v26 = vpack.c.bf16 %v2312_v9, %v2300_v61  ;;  %v6992_v10 = vand.u32 4294901760, %v6231_v24 }
 0x18f   : > { %v6478_v35 = vpack.c.bf16 %v6991_v40, %v6990_v34  ;;  %v2324_v49 = vand.u32 4294901760, %v2323_v25  ;;  %v2336_v0 = vand.u32 4294901760, %v2335_v17  ;;  %v6993_v8 = vand.u32 4294901760, %v6236_v27 }
 0x190   : > { %5208 = vmatprep.subr.bf16.mxu0 %v5207_v2  ;;  %v6488_v31 = vpack.c.bf16 %v2330_v5, %v2318_v38  ;;  %v6994_v41 = vand.u32 4294901760, %v6239_v29  ;;  %v6995_v34 = vand.u32 4294901760, %v6246_v33  ;;  %v6996_v17 = vand.u32 4294901760, %v6320_v11 }
 0x191   : > { %v6486_v6 = vpack.c.bf16 %v6993_v8, %v6992_v10  ;;  %v6490_v2 = vpack.c.bf16 %v2336_v0, %v2324_v49  ;;  %v6997_v25 = vand.u32 4294901760, %v6322_v12  ;;  %v6998_v0 = vand.u32 4294901760, %v6324_v13 }
 0x192   : > { %v6496_v40 = vpack.c.bf16 %v6995_v34, %v6994_v41  ;;  %v6999_v49 = vand.u32 4294901760, %v6326_v14  ;;  %v7000_v10 = vand.u32 4294901760, %v6328_v15  ;;  %v7001_v8 = vand.u32 4294901760, %v6330_v16 }
 0x193   : > { %v6504_v1 = vpack.c.bf16 %v6997_v25, %v6996_v17  ;;  %v7003_v17 = vand.u32 4294901760, %v6333_v19  ;;  %v7004_v25 = vand.u32 4294901760, %v6335_v20  ;;  %v6536_v9 = vpack.c.bf16 %v2304_v36, %v2292_v60  ;;  %v7031_v36 = vld [vmem:[#allocation42_spill] sm:$0xff] }
 0x194   : > { %v6512_v38 = vpack.c.bf16 %v6999_v49, %v6998_v0  ;;  %v6520_v41 = vpack.c.bf16 %v7001_v8, %v7000_v10  ;;  %v7006_v0 = vand.u32 4294901760, %v6339_v28  ;;  %v7007_v49 = vand.u32 4294901760, %v6341_v30 }
 0x195   : > { %v6528_v61 = vpack.c.bf16 %v7004_v25, %v7003_v17  ;;  %v6540_v10 = vpack.c.bf16 %v2328_v37, %v2316_v53  ;;  %v6542_v8 = vpack.c.bf16 %v2334_v59, %v2322_v55  ;;  %v7008_v60 = vmov 0.0   ;;  %v7035_v53 = vld [vmem:[#allocation34_spill] sm:$0xff] }
 0x196   : > { %7002 = vst [vmem:[#allocation45_spill] sm:$0xff] %v6520_v41  ;;  %v6534_v5 = vpack.c.bf16 %v7007_v49, %v7006_v0 }
 0x197   : > { %7005 = vst [vmem:[#allocation46_spill] sm:$0xff] %v6528_v61 }
 0x228   : > { %v1041_v34 = vpop.f32.mrb[0].mxu0 }
 0x229   : > { %v1064_v63 = vsel %vm1062_vm4, %v1041_v34, 0  ;;  %v5012_v39 = vpop.f32.mrb[1].mxu0 }
 0x22a   : > { %v6544_v17 = vand.u32 4294901760, %v1064_v63  ;;  %v7009_v39 = vpack.c.bf16 %v6227_v22, %v6222_v18  ;;  %v7013_v18 = vpack.c.bf16 %v6326_v14, %v6324_v13  ;;  %v7014_v22 = vpack.c.bf16 %v6330_v16, %v6328_v15 }
 0x22c   : > { %v1148_v25 = vsub.f32 %v1064_v63, %v6544_v17  ;;  %v3746_v63 = vld [vmem:[%s517_s30] sm:$0xf] }
 0x22d   : > { %v3748_v54 = vsel %vm595_vm1, %v3746_v63, 0 }
 0x22e   : > { %v1149_v61 = vand.u32 4294901760, %v1148_v25  ;;  %v3751_v37 = vand.u32 4294901760, %v3748_v54 }
 0x230   : > { %v1150_v41 = vsub.f32 %v1148_v25, %v1149_v61  ;;  %v3828_v55 = vsub.f32 %v3748_v54, %v3751_v37 }
 0x232   : > { %v1151_v0 = vand.u32 4294901760, %v1150_v41  ;;  %v3829_v59 = vand.u32 4294901760, %v3828_v55  ;;  %v3220_v41 = vld [vmem:[%s7036_s3] sm:$0xff] }
 0x233   : > { %v3236_v49 = vand.u32 4294901760, %v3220_v41 }
 0x234   : > { %1152 = vmatmul.mubr.f32.vlgmr.msra.gmra.mrb[0].mxu1 %v1151_v0 }
 0x235   : > { %5122 = vmatpush1.bf16.msra.mxu1 %v6367_v51  ;;  %1302 = vmatprep.mubr.f32.mxu1 %v7008_v60  ;;  %v7010_v51 = vpack.c.bf16 %v6236_v27, %v6231_v24  ;;  %v7015_v24 = vpack.c.bf16 %v6335_v20, %v6333_v19  ;;  %v7016_v27 = vpack.c.bf16 %v6341_v30, %v6339_v28  ;;  %v7017_v19 = vld [vmem:[#allocation36_spill] sm:$0xff]  ;;  %v7018_v20 = vld [vmem:[#allocation37_spill] sm:$0xff] }
 0x236   : > { %5124 = vmatprep.subr.bf16.mxu1 %v6381_v3  ;;  %v7011_v3 = vpack.c.bf16 %v6246_v33, %v6239_v29  ;;  %v7019_v28 = vpack.c.bf16 %v6432_v44, %v6430_v46  ;;  %v7023_v44 = vld [vmem:[#allocation45_spill] sm:$0xff]  ;;  %v7028_v46 = vld [vmem:[#allocation38_spill] sm:$0xff] }
 0x239   : > { %5126 = vmatpush1.bf16.msra.mxu1 %v6383_v4  ;;  %v7012_v4 = vpack.c.bf16 %v6322_v12, %v6320_v11 }
 0x23a   : > { %5128 = vmatprep.subr.bf16.mxu1 %v6395_v45  ;;  %v7024_v45 = vld [vmem:[#allocation44_spill] sm:$0xff] }
 0x23d   : > { %5130 = vmatpush1.bf16.msra.mxu1 %v6406_v58  ;;  %v7025_v58 = vld [vmem:[#allocation43_spill] sm:$0xff] }
 0x23e   : > { %5132 = vmatprep.subr.bf16.mxu1 %v6408_v62  ;;  %v7026_v62 = vpack.c.bf16 %v7024_v45, %v7025_v58  ;;  %v6743_v45 = vstv %s589_s11 }
 0x241   : > { %5134 = vmatpush1.bf16.msra.mxu1 %v6410_v7  ;;  %v7027_v7 = vld [vmem:[#allocation46_spill] sm:$0xff] }
 0x242   : > { %5136 = vmatprep.subr.bf16.mxu1 %v7009_v39  ;;  %v6725_v39 = vsub.f32 %v3220_v41, %v3236_v49 }
 0x244   : > { %1304 = vmatmul.mubr.f32.vlgmr.msra.gmra.mrb[0].mxu1 %v6544_v17 }
 0x245   : > { %5138 = vmatpush1.bf16.msra.mxu1 %v7010_v51  ;;  %1406 = vmatprep.mubr.f32.mxu1 %v7008_v60 }
 0x246   : > { %5140 = vmatprep.subr.bf16.mxu1 %v7011_v3 }
 0x249   : > { %5142 = vmatpush1.bf16.msra.mxu1 %v7012_v4 }
 0x24a   : > { %5144 = vmatprep.subr.bf16.mxu1 %v7013_v18  ;;  %v3322_v18 = vand.u32 4294901760, %v6725_v39 }
 0x24d   : > { %5146 = vmatpush1.bf16.msra.mxu1 %v7014_v22 }
 0x24e   : > { %5148 = vmatprep.subr.bf16.mxu1 %v7015_v24 }
 0x251   : > { %5150 = vmatpush1.bf16.msra.mxu1 %v7016_v27 }
 0x252   : > { %5152 = vmatprep.subr.bf16.mxu1 %v6225_v21 }
 0x254   : > { %1409 = vmatmul.mubr.f32.vlgmr.msra.gmra.mrb[0].mxu1 %v1148_v25  ;;  %v2183_v29 = vpop.f32.mrb[2].mxu0 }
 0x255   : > { %5154 = vmatpush1.bf16.msra.mxu1 %v6229_v23  ;;  %v2197_v33 = vsel %vm2195_vm5, %v2183_v29, 0  ;;  %v5042_v11 = vpop.f32.mrb[3].mxu0  ;;  %1495 = vmatprep.mubr.f32.mxu1 %v7008_v60  ;;  %v3323_v29 = vsub.f32 %v6725_v39, %v3322_v18 }
 0x256   : > { %v6584_v12 = vand.u32 4294901760, %v2197_v33  ;;  %5156 = vmatprep.subr.bf16.mxu1 %v6244_v32 }
 0x258   : > { %v2280_v13 = vsub.f32 %v2197_v33, %v6584_v12 }
 0x259   : > { %5158 = vmatpush1.bf16.msra.mxu1 %v6299_v47 }
 0x25a   : > { %v2281_v14 = vand.u32 4294901760, %v2280_v13  ;;  %5160 = vmatprep.subr.bf16.mxu1 %v6302_v56 }
 0x25c   : > { %v2282_v15 = vsub.f32 %v2280_v13, %v2281_v14 }
 0x25d   : > { %5162 = vmatpush1.bf16.msra.mxu1 %v6304_v57 }
 0x25e   : > { %v2283_v16 = vand.u32 4294901760, %v2282_v15  ;;  %5164 = vmatprep.subr.bf16.mxu1 %v7017_v19 }
 0x260   : > { %2284 = vmatmul.mubr.f32.vlgmr.msra.gmra.mrb[4].mxu0 %v2283_v16 }
 0x261   : > { %5166 = vmatpush1.bf16.msra.mxu1 %v7018_v20  ;;  %5210 = vmatpush1.bf16.msra.mxu0 %v6480_v26  ;;  %v7020_v26 = vpack.c.bf16 %v6438_v52, %v6436_v43  ;;  %v7029_v43 = vld [vmem:[#allocation39_spill] sm:$0xff]  ;;  %v2770_v52 = vld [vmem:[%s508_s13] sm:$0xf]  ;;  %s7040_s13 = sld [smem:[#allocation52_spill]] }
 0x262   : > { %5168 = vmatprep.subr.bf16.mxu1 %v6478_v35  ;;  %5212 = vmatprep.subr.bf16.mxu0 %v6488_v31  ;;  %v2772_v42 = vsel %vm595_vm1, %v2770_v52, 0  ;;  %v7033_v35 = vld [vmem:[#allocation32_spill] sm:$0xff]  ;;  %v3830_v31 = vsub.f32 %v3828_v55, %v3829_v59 }
 0x263   : > { %2394 = vmatprep.mubr.f32.mxu0 %v7008_v60 }
 0x264   : > { %1499 = vmatmul.mubr.f32.vlgmr.msra.gmra.mrb[0].mxu1 %v1149_v61  ;;  %v3222_v61 = vld [vmem:[%s7036_s3 + $0x10] sm:$0x1] }
 0x265   : > { %5170 = vmatpush1.bf16.msra.mxu1 %v6486_v6  ;;  %5214 = vmatpush1.bf16.msra.mxu0 %v6490_v2  ;;  %v7021_v6 = vld [vmem:[#allocation41_spill] sm:$0xff]  ;;  %v3831_v2 = vand.u32 4294901760, %v3830_v31  ;;  %v3229_v34 = vsel %vm2199_vm3, %v3222_v61, 0 }
 0x266   : > { %5172 = vmatprep.subr.bf16.mxu1 %v6496_v40  ;;  %5216 = vmatprep.subr.bf16.mxu0 %v7019_v28  ;;  %v7022_v30 = vpack.c.bf16 %v6451_v50, %v7021_v6  ;;  %v7030_v50 = vld [vmem:[#allocation40_spill] sm:$0xff]  ;;  %v5793_v6 = vmov 1966171168  }
 0x267   : > { %1617 = vmatprep.mubr.f32.mxu1 %v7008_v60  ;;  %v3223_v40 = vld [vmem:[%s7036_s3 + $0x18] sm:$0x1]  ;;  %s6805_s30 = scalar_lea.hbm %s7040_s13, %s4934_s21 }
 0x268   : > { %2396 = vmatmul.mubr.f32.vlgmr.msra.gmra.mrb[4].mxu0 %v6584_v12 }
 0x269   : > { %5174 = vmatpush1.bf16.msra.mxu1 %v6504_v1  ;;  %5218 = vmatpush1.bf16.msra.mxu0 %v7020_v26  ;;  %v3232_v1 = vsel %vm2199_vm3, %v3223_v40, 0 }
 0x26a   : > { %5176 = vmatprep.subr.bf16.mxu1 %v6512_v38  ;;  %5220 = vmatprep.subr.bf16.mxu0 %v7022_v30  ;;  %v1717_v30 = vunpack.c.l.s4 %v5793_v6 }
 0x26b   : > { %2482 = vmatprep.mubr.f32.mxu0 %v7008_v60 }
 0x26c   : > { %v1718_v58 = vunpack.c.0.s8 %v1717_v30 }
 0x26d   : > { %5178 = vmatpush1.bf16.msra.mxu1 %v7023_v44  ;;  %5222 = vmatpush1.bf16.msra.mxu0 %v7026_v62  ;;  %v1719_v44 = vlaneseq }
 0x26e   : > { %5180 = vmatprep.subr.bf16.mxu1 %v7027_v7  ;;  %5224 = vmatprep.subr.bf16.mxu0 %v7028_v46 }
 0x26f   : > { %v1720_v62 = vshrl.u32 %v1719_v44, 7  ;;  %vm6753_vm6 = vcmp.lt.s32.totalorder %v1719_v44, 256 }
 0x270   : > { %2485 = vmatmul.mubr.f32.vlgmr.msra.gmra.mrb[4].mxu0 %v2280_v13 }
 0x271   : > { %5182 = vmatpush1.bf16.msra.mxu1 %v6534_v5  ;;  %5226 = vmatpush1.bf16.msra.mxu0 %v7029_v43  ;;  %v3238_v5 = vand.u32 4294901760, %v3232_v1  ;;  %v6747_v52 = vsub.s32 %v1718_v58, %v1720_v62 }
 0x272   : > { %5184 = vmatprep.subr.bf16.mxu1 %v6225_v21  ;;  %5228 = vmatprep.subr.bf16.mxu0 %v7030_v50  ;;  %v2775_v21 = vand.u32 4294901760, %v2772_v42 }
 0x273   : > { %2563 = vmatprep.mubr.f32.mxu0 %v7008_v60  ;;  %v6721_v25 = vsub.f32 %v3232_v1, %v3238_v5 }
 0x274   : > { %1619 = vmatmul.mubr.f32.vlgmr.msra.gmra.mrb[0].mxu1 %v6544_v17 }
 0x275   : > { %5186 = vmatpush1.bf16.msra.mxu1 %v6229_v23  ;;  %5230 = vmatpush1.bf16.msra.mxu0 %v7031_v36  ;;  %v2852_v23 = vsub.f32 %v2772_v42, %v2775_v21  ;;  %v3328_v4 = vand.u32 4294901760, %v6721_v25 }
 0x276   : > { %5188 = vmatprep.subr.bf16.mxu1 %v6244_v32  ;;  %5232 = vmatprep.subr.bf16.mxu0 %v6536_v9  ;;  %v3221_v9 = vld [vmem:[%s7036_s3 + $0x8] sm:$0xff] }
 0x277   : > { %1705 = vmatprep.mubr.f32.mxu1 %v7008_v60  ;;  %v2853_v32 = vand.u32 4294901760, %v2852_v23  ;;  %v3234_v38 = vand.u32 4294901760, %v3221_v9  ;;  %v3329_v27 = vsub.f32 %v6721_v25, %v3328_v4 }
 0x278   : > { %2567 = vmatmul.mubr.f32.vlgmr.msra.gmra.mrb[4].mxu0 %v2281_v14  ;;  %v3324_v14 = vand.u32 4294901760, %v3323_v29 }
 0x279   : > { %5190 = vmatpush1.bf16.msra.mxu1 %v6299_v47  ;;  %5234 = vmatpush1.bf16.msra.mxu0 %v6538_v48  ;;  %v2854_v47 = vsub.f32 %v2852_v23, %v2853_v32  ;;  %v7034_v48 = vld [vmem:[#allocation33_spill] sm:$0xff] }
 0x27a   : > { %5192 = vmatprep.subr.bf16.mxu1 %v6302_v56  ;;  %5236 = vmatprep.subr.bf16.mxu0 %v6540_v10  ;;  %v3240_v10 = vand.u32 4294901760, %v3229_v34 }
 0x27b   : > { %2661 = vmatprep.mubr.f32.mxu0 %v7008_v60  ;;  %v2855_v56 = vand.u32 4294901760, %v2854_v47 }
 0x27c   : > { %v6723_v0 = vpack.c.bf16 %v3240_v10, %v3236_v49  ;;  %v6727_v51 = vsub.f32 %v3229_v34, %v3240_v10 }
 0x27d   : > { %5194 = vmatpush1.bf16.msra.mxu1 %v6304_v57  ;;  %5238 = vmatpush1.bf16.msra.mxu0 %v6542_v8  ;;  %v7032_v57 = vld [vmem:[#allocation35_spill] sm:$0xff]  ;;  %v6717_v8 = vpack.c.bf16 %v3238_v5, %v3234_v38 }
 0x27e   : > { %5196 = vmatprep.subr.bf16.mxu1 %v7017_v19  ;;  %5240 = vmatprep.subr.bf16.mxu0 %v7028_v46  ;;  %v3334_v22 = vand.u32 4294901760, %v6727_v51 }
 0x280   : > { %2663 = vmatmul.mubr.f32.vlgmr.msra.gmra.mrb[4].mxu0 %v6584_v12  ;;  %v3335_v33 = vsub.f32 %v6727_v51, %v3334_v22  ;;  %v5265_v26 = vpack.c.bf16 %v3334_v22, %v3322_v18 }
 0x281   : > { %5198 = vmatpush1.bf16.msra.mxu1 %v7018_v20  ;;  %5242 = vmatpush1.bf16.msra.mxu0 %v7029_v43  ;;  %v5257_v20 = vpack.c.bf16 %v6727_v51, %v6725_v39 }
 0x282   : > { %5244 = vmatprep.subr.bf16.mxu0 %v7030_v50  ;;  %2741 = vmatprep.mubr.f32.mxu0 %v7008_v60  ;;  %v3336_v15 = vand.u32 4294901760, %v3335_v33  ;;  %v4692_v33 = vld [vmem:[%s6178_s14] sm:$0xff]  ;;  %s7039_s14 = sld [smem:[#allocation31_spill]] }
 0x283   : > { %5248 = vmatprep.subr.bf16.mxu1 %v6717_v8  ;;  %4697 = vst [vmem:[%s6758_s26 + $0x8] sm:$0xf0] %v4692_v33 }
 0x284   : > { %1707 = vmatmul.mubr.f32.vlgmr.msra.gmra.mrb[0].mxu1 %v6544_v17  ;;  %v6719_v17 = vsub.f32 %v3221_v9, %v3234_v38  ;;  %v5253_v19 = vpack.c.bf16 %v3336_v15, %v3324_v14  ;;  %v4196_v9 = vld [vmem:[#allocation15] sm:$0xff] }
 0x285   : > { %5246 = vmatpush1.bf16.msra.mxu0 %v7031_v36  ;;  %3302 = vmatprep.mubr.f32.mxu1 %v7008_v60  ;;  %v4198_v1 = vcombine.high %v4196_v9, %v4196_v9  ;;  %v4202_v5 = vsel %vm595_vm1, %v4196_v9, 0 }
 0x286   : > { %5043 = vmatprep.subr.mxu0 %v7008_v60  ;;  %v3316_v3 = vand.u32 4294901760, %v6719_v17  ;;  %5250 = vmatpush1.bf16.msra.mxu1 %v6723_v0  ;;  %v5255_v13 = vpack.c.bf16 %v6721_v25, %v6719_v17  ;;  %v4208_v41 = vand.u32 4294901760, %v4202_v5 }
 0x287   : > { %v4204_v61 = vsel %vm595_vm1, %v4198_v1, 0 }
 0x288   : > { %2743 = vmatmul.mubr.f32.vlgmr.msra.gmra.mrb[4].mxu0 %v6584_v12  ;;  %v3317_v24 = vsub.f32 %v6719_v17, %v3316_v3  ;;  %v3330_v12 = vand.u32 4294901760, %v3329_v27  ;;  %v5263_v28 = vpack.c.bf16 %v3328_v4, %v3316_v3  ;;  %v4206_v38 = vand.u32 4294901760, %v4204_v61  ;;  %p7041_p3 = scmp.ne.s32.totalorder %s7039_s14, 0 }
 0x289   : > { %5044 = vmatpush3.msra.mxu0 %v2775_v21  ;;  %5045 = vmatprep.mubr.msk.f32.mxu0 %vm5792_vm0, %v7008_v60  ;;  %v4291_v49 = vsub.f32 %v4202_v5, %v4208_v41 }
 0x28a   : > { %5048 = vmatprep.subr.mxu0 %v7008_v60  ;;  %v3318_v11 = vand.u32 4294901760, %v3317_v24  ;;  %v4285_v34 = vsub.f32 %v4204_v61, %v4206_v38  ;;  %p5699_p12 = pnand %p5698_p5, %p7041_p3 }
 0x28b   : > { %v4292_v51 = vand.u32 4294901760, %v4291_v49 }
 0x28c   : > { %5046 = vmatmul.mubr.f32.vlgmr.msra.gmra.mrb[6].mxu0 %v7032_v57  ;;  %v5251_v16 = vpack.c.bf16 %v3330_v12, %v3318_v11  ;;  %v4286_v10 = vand.u32 4294901760, %v4285_v34  ;;  %v4694_v11 = vcombine.low %v4692_v33, %v4692_v33  ;;  %p5700_p6 = pneg %p5699_p12 }
 0x28d   : > { %5049 = vmatpush3.msra.mxu0 %v2855_v56  ;;  %5050 = vmatprep.mubr.msk.f32.mxu0 %vm5792_vm0, %v7008_v60  ;;  %v4293_v22 = vsub.f32 %v4291_v49, %v4292_v51 }
 0x28e   : > { %5053 = vmatprep.subr.mxu0 %v7008_v60  ;;  %5252 = vmatprep.subr.bf16.mxu1 %v5251_v16  ;;  %v4287_v4 = vsub.f32 %v4285_v34, %v4286_v10  ;;  %4696 = vst [vmem:[%s6758_s26] sm:$0xf0] %v4694_v11  ;;  %p5707_p13 = pnand %p5706_p8, %p5700_p6 }
 0x28f   : > { %v4294_v29 = vand.u32 4294901760, %v4293_v22 }
 0x294   : > { %5051 = vmatmul.mubr.f32.vlgmr.msra.gmra.mrb[6].mxu0 %v7033_v35 }
 0x295   : > { %5054 = vmatpush3.msra.mxu0 %v2852_v23  ;;  %5055 = vmatprep.mubr.msk.f32.mxu0 %vm5792_vm0, %v7008_v60 }
 0x296   : > { %5058 = vmatprep.subr.mxu0 %v7008_v60 }
 0x29c   : > { %5056 = vmatmul.mubr.f32.vlgmr.msra.gmra.mrb[6].mxu0 %v7034_v48 }
 0x29d   : > { %5059 = vmatpush3.msra.mxu0 %v2775_v21  ;;  %5060 = vmatprep.mubr.msk.f32.mxu0 %vm5792_vm0, %v7008_v60 }
 0x29e   : > { %5063 = vmatprep.subr.mxu0 %v7008_v60 }
 0x2a4   : > { %5061 = vmatmul.mubr.f32.vlgmr.msra.gmra.mrb[6].mxu0 %v7035_v53 }
 0x2a5   : > { %5064 = vmatpush3.msra.mxu0 %v2853_v32  ;;  %5065 = vmatprep.mubr.msk.f32.mxu0 %vm5792_vm0, %v7008_v60 }
 0x2a6   : > { %5068 = vmatprep.subr.mxu0 %v7008_v60 }
 0x2ac   : > { %5066 = vmatmul.mubr.f32.vlgmr.msra.gmra.mrb[6].mxu0 %v7033_v35 }
 0x2ad   : > { %5069 = vmatpush3.msra.mxu0 %v2775_v21  ;;  %5070 = vmatprep.mubr.msk.f32.mxu0 %vm5792_vm0, %v7008_v60 }
 0x2ae   : > { %5073 = vmatprep.subr.mxu0 %v7008_v60 }
 0x2b4   : > { %5071 = vmatmul.mubr.f32.vlgmr.msra.gmra.mrb[6].mxu0 %v7033_v35 }
 0x2b5   : > { %5074 = vmatpush3.msra.mxu0 %v3751_v37  ;;  %5075 = vmatprep.mubr.msk.f32.mxu0 %vm5792_vm0, %v7008_v60 }
 0x2b6   : > { %5078 = vmatprep.subr.mxu0 %v7008_v60 }
 0x2b8   : > { %5076 = vmatmul.mubr.f32.vlgmr.msra.gmra.mrb[8].mxu0 %v7032_v57 }
 0x2b9   : > { %5079 = vmatpush3.msra.mxu0 %v3831_v2  ;;  %5080 = vmatprep.mubr.msk.f32.mxu0 %vm5792_vm0, %v7008_v60 }
 0x2ba   : > { %5083 = vmatprep.subr.mxu0 %v7008_v60 }
 0x2c0   : > { %5081 = vmatmul.mubr.f32.vlgmr.msra.gmra.mrb[8].mxu0 %v7033_v35 }
 0x2c1   : > { %5084 = vmatpush3.msra.mxu0 %v3828_v55  ;;  %5085 = vmatprep.mubr.msk.f32.mxu0 %vm5792_vm0, %v7008_v60 }
 0x2c2   : > { %5088 = vmatprep.subr.mxu0 %v7008_v60 }
 0x2c8   : > { %5086 = vmatmul.mubr.f32.vlgmr.msra.gmra.mrb[8].mxu0 %v7034_v48 }
 0x2c9   : > { %5089 = vmatpush3.msra.mxu0 %v3751_v37  ;;  %5090 = vmatprep.mubr.msk.f32.mxu0 %vm5792_vm0, %v7008_v60 }
 0x2ca   : > { %5093 = vmatprep.subr.mxu0 %v7008_v60 }
 0x2d0   : > { %5091 = vmatmul.mubr.f32.vlgmr.msra.gmra.mrb[8].mxu0 %v7035_v53 }
 0x2d1   : > { %5094 = vmatpush3.msra.mxu0 %v3829_v59  ;;  %5095 = vmatprep.mubr.msk.f32.mxu0 %vm5792_vm0, %v7008_v60 }
 0x2d2   : > { %5098 = vmatprep.subr.mxu0 %v7008_v60 }
 0x2d8   : > { %5096 = vmatmul.mubr.f32.vlgmr.msra.gmra.mrb[8].mxu0 %v7033_v35 }
 0x2d9   : > { %5099 = vmatpush3.msra.mxu0 %v3751_v37  ;;  %5100 = vmatprep.mubr.msk.f32.mxu0 %vm5792_vm0, %v7008_v60 }
 0x2e0   : > { %5101 = vmatmul.mubr.f32.vlgmr.msra.gmra.mrb[8].mxu0 %v7033_v35 }
 0x357   : > { %v1708_v7 = vpop.f32.mrb[0].mxu1 }
 0x358   : > { %v5271_v46 = vadd.f32 %v1708_v7, %v6743_v45  ;;  %v1710_v43 = vpop.f32.mrb[1].mxu1 }
 0x359   : > { %v5272_v50 = vadd.f32 %v1710_v43, %v6743_v45 }
 0x35b   : > { %v1715_v36 = vcombine.low %v5271_v46, %v5272_v50  ;;  %v2744_v42 = vpop.f32.mrb[4].mxu0 }
 0x35c   : > { %v5273_v21 = vadd.f32 %v2744_v42, %v6743_v45  ;;  %v2746_v23 = vpop.f32.mrb[5].mxu0 }
 0x35d   : > { %v1722_v32 = vrot.slane %v1715_v36, %v6747_v52  ;;  %v5274_v47 = vadd.f32 %v2746_v23, %v6743_v45 }
 0x35f   : > { %v1729_v57 = vrot.slane %v1722_v32, %v6747_v52  ;;  %v2751_v35 = vcombine.low %v5273_v21, %v5274_v47 }
 0x361   : > { %1735 = vst.msk [vmem:[%s6758_s26] ss:$8 sm:$0x3] %vm6753_vm6, %v1729_v57  ;;  %v2758_v48 = vrot.slane %v2751_v35, %v6747_v52 }
 0x363   : > { %v2765_v63 = vrot.slane %v2758_v48, %v6747_v52 }
 0x365   : > { %4925 = vst.msk [vmem:[%s6758_s26 + $0x1] ss:$8 sm:$0x3] %vm6753_vm6, %v2765_v63 }
 0x387   : > { %v3216_v54 = vpop.f32.mrb[6].mxu0 }
 0x388   : > { %v3226_v53 = vsel %vm3224_vm7, %v3216_v54, 0  ;;  %v5072_v37 = vpop.f32.mrb[7].mxu0 }
 0x389   : > { %v3303_v55 = vand.u32 4294901760, %v3226_v53 }
 0x38b   : > { %v3304_v59 = vsub.f32 %v3226_v53, %v3303_v55 }
 0x38d   : > { %v3305_v31 = vand.u32 4294901760, %v3304_v59 }
 0x38f   : > { %v3306_v2 = vsub.f32 %v3304_v59, %v3305_v31 }
 0x391   : > { %v3307_v40 = vand.u32 4294901760, %v3306_v2 }
 0x393   : > { %3308 = vmatmul.mubr.f32.vlgmr.msra.gmra.mrb[2].mxu1 %v3307_v40 }
 0x394   : > { %5254 = vmatpush1.bf16.msra.mxu1 %v5253_v19  ;;  %3398 = vmatprep.mubr.f32.mxu1 %v7008_v60 }
 0x395   : > { %5256 = vmatprep.subr.bf16.mxu1 %v5255_v13 }
 0x39b   : > { %3400 = vmatmul.mubr.f32.vlgmr.msra.gmra.mrb[2].mxu1 %v3303_v55 }
 0x39c   : > { %5258 = vmatpush1.bf16.msra.mxu1 %v5257_v20  ;;  %3478 = vmatprep.mubr.f32.mxu1 %v7008_v60 }
 0x39d   : > { %5260 = vmatprep.subr.bf16.mxu1 %v6717_v8 }
 0x3a3   : > { %3481 = vmatmul.mubr.f32.vlgmr.msra.gmra.mrb[2].mxu1 %v3304_v59 }
 0x3a4   : > { %5262 = vmatpush1.bf16.msra.mxu1 %v6723_v0  ;;  %3555 = vmatprep.mubr.f32.mxu1 %v7008_v60 }
 0x3a5   : > { %5264 = vmatprep.subr.bf16.mxu1 %v5263_v28 }
 0x3ab   : > { %3559 = vmatmul.mubr.f32.vlgmr.msra.gmra.mrb[2].mxu1 %v3305_v31 }
 0x3ac   : > { %5266 = vmatpush1.bf16.msra.mxu1 %v5265_v26  ;;  %3641 = vmatprep.mubr.f32.mxu1 %v7008_v60 }
 0x3ad   : > { %5268 = vmatprep.subr.bf16.mxu1 %v6717_v8  ;;  %v4288_v8 = vand.u32 4294901760, %v4287_v4 }
 0x3b3   : > { %3643 = vmatmul.mubr.f32.vlgmr.msra.gmra.mrb[2].mxu1 %v3303_v55  ;;  %v4192_v17 = vpop.f32.mrb[8].mxu0 }
 0x3b4   : > { %5270 = vmatpush1.bf16.msra.mxu1 %v6723_v0  ;;  %v4200_v25 = vsel %vm591_vm2, %v4192_v17, 0  ;;  %v5102_v39 = vpop.f32.mrb[9].mxu0  ;;  %3717 = vmatprep.mubr.f32.mxu1 %v7008_v60 }
 0x3b5   : > { %v4273_v3 = vand.u32 4294901760, %v4200_v25  ;;  %4207 = vmatprep.subr.mxu1 %v4206_v38 }
 0x3b7   : > { %v4274_v18 = vsub.f32 %v4200_v25, %v4273_v3 }
 0x3b9   : > { %v4275_v24 = vand.u32 4294901760, %v4274_v18 }
 0x3bb   : > { %v4276_v27 = vsub.f32 %v4274_v18, %v4275_v24  ;;  %3719 = vmatmul.mubr.f32.vlgmr.msra.gmra.mrb[2].mxu1 %v3303_v55 }
 0x3bc   : > { %4209 = vmatpush1.msra.mxu1 %v4208_v41  ;;  %4272 = vmatprep.mubr.f32.mxu1 %v7008_v60 }
 0x3bd   : > { %v4277_v0 = vand.u32 4294901760, %v4276_v27  ;;  %4289 = vmatprep.subr.mxu1 %v4288_v8 }
 0x3bf   : > { %4278 = vmatmul.mubr.f32.vlgmr.msra.gmra.mrb[4].mxu1 %v4277_v0 }
 0x3c0   : > { %4295 = vmatpush1.msra.mxu1 %v4294_v29  ;;  %4358 = vmatprep.mubr.f32.mxu1 %v7008_v60 }
 0x3c1   : > { %4368 = vmatprep.subr.mxu1 %v4285_v34 }
 0x3c7   : > { %4360 = vmatmul.mubr.f32.vlgmr.msra.gmra.mrb[4].mxu1 %v4273_v3 }
 0x3c8   : > { %4371 = vmatpush1.msra.mxu1 %v4291_v49  ;;  %4434 = vmatprep.mubr.f32.mxu1 %v7008_v60 }
 0x3c9   : > { %4444 = vmatprep.subr.mxu1 %v4206_v38 }
 0x3cf   : > { %4437 = vmatmul.mubr.f32.vlgmr.msra.gmra.mrb[4].mxu1 %v4274_v18 }
 0x3d0   : > { %4446 = vmatpush1.msra.mxu1 %v4208_v41  ;;  %4509 = vmatprep.mubr.f32.mxu1 %v7008_v60 }
 0x3d1   : > { %4522 = vmatprep.subr.mxu1 %v4286_v10 }
 0x3d7   : > { %4513 = vmatmul.mubr.f32.vlgmr.msra.gmra.mrb[4].mxu1 %v4275_v24 }
 0x3d8   : > { %4526 = vmatpush1.msra.mxu1 %v4292_v51  ;;  %4589 = vmatprep.mubr.f32.mxu1 %v7008_v60 }
 0x3d9   : > { %4598 = vmatprep.subr.mxu1 %v4206_v38 }
 0x3df   : > { %4591 = vmatmul.mubr.f32.vlgmr.msra.gmra.mrb[4].mxu1 %v4273_v3 }
 0x3e0   : > { %4600 = vmatpush1.msra.mxu1 %v4208_v41  ;;  %4663 = vmatprep.mubr.f32.mxu1 %v7008_v60 }
 0x3e7   : > { %4665 = vmatmul.mubr.f32.vlgmr.msra.gmra.mrb[4].mxu1 %v4273_v3 }
 0x48e   : > { %v3720_v12 = vpop.f32.mrb[2].mxu1 }
 0x48f   : > { %v5275_v13 = vadd.f32 %v3720_v12, %v6743_v45  ;;  %v3722_v14 = vpop.f32.mrb[3].mxu1 }
 0x490   : > { %v5276_v15 = vadd.f32 %v3722_v14, %v6743_v45 }
 0x492   : > { %v3727_v16 = vcombine.low %v5275_v13, %v5276_v15 }
 0x494   : > { %v3734_v19 = vrot.slane %v3727_v16, %v6747_v52 }
 0x496   : > { %v3741_v60 = vrot.slane %v3734_v19, %v6747_v52 }
 0x498   : > { %4926 = vst.msk [vmem:[%s6758_s26 + $0x2] ss:$8 sm:$0x3] %vm6753_vm6, %v3741_v60 }
 0x4ba   : > { %v4666_v20 = vpop.f32.mrb[4].mxu1 }
 0x4bb   : > { %v5277_v28 = vadd.f32 %v4666_v20, %v6743_v45  ;;  %v4668_v26 = vpop.f32.mrb[5].mxu1 }
 0x4bc   : > { %v5278_v6 = vadd.f32 %v4668_v26, %v6743_v45 }
 0x4be   : > { %v4673_v30 = vcombine.low %v5277_v28, %v5278_v6 }
 0x4c0   : > { %v4680_v44 = vrot.slane %v4673_v30, %v6747_v52 }
 0x4c2   : > { %v4687_v58 = vrot.slane %v4680_v44, %v6747_v52 }
 0x4c4   : > { %4927 = vst.msk [vmem:[%s6758_s26 + $0x3] ss:$8 sm:$0x3] %vm6753_vm6, %v4687_v58 }
 0x4c5   : > { %5710 = shalt.err (!%p5707_p13)
}
 0x4c6   : > { %s5711_s29 = scalar_lea.hbm %s6805_s30, 256  ;;  %s5715_s12 = scalar_lea.hbm %s7040_s13, 512 }
 0x4c7   : > { %p5712_p4 = scmp.ne.s32.totalorder %s6805_s30, %s5711_s29  ;;  %p5716_p7 = scmp.lt.u32.totalorder %s6805_s30, %s7040_s13 }
 0x4c8   : > { %p5717_p0 = scmp.lt.u32.totalorder %s5715_s12, %s5711_s29  ;;  %p5719_p5 = scmp.lt.u32.totalorder %s5711_s29, %s6805_s30 }
 0x4c9   : > { %p5713_p2 = pnand %p5712_p4, %p7041_p3 }
 0x4ca   : > { %p5718_p9 = por %p5717_p0, %p5716_p7 }
 0x4cb   : > { %p5714_p10 = pneg %p5713_p2 }
 0x4cc   : > { %p5720_p12 = por %p5719_p5, %p5718_p9 }
 0x4ce   : > { %p5721_p6 = pnand %p5720_p12, %p5714_p10 }
 0x4d0   : > { %5724 = shalt.err (!%p5721_p6)
}
 0x4d1   : > { %5381 = dma.vmem_to_hbm [thread:$0]  (%p7041_p3), %s6807_s5, 256, %s6805_s30, %s4699_s15  }
 0x4d2 PF: > { %s7042_s19 = sld [smem:[#allocation24_spill]]  ;;  %s7043_s0 = sld [smem:[#allocation28_spill]] }
 0x4d3   : > { %p7045_p1 = scmp.ge.s32.totalorder %s5779_s22, 2 }
 0x4d8   : > { %s4725_s11 = sand.u32 1, %s7042_s19   ;;  %p7044_p11 = scmp.ne.s32.totalorder %s7043_s0, 0 }
 0x4d9   : > { %s4726_s9 = scalar_lea.sflag [#allocation5], %s4725_s11 }
 0x4da   : > { %p5410_p8 = pnand %p7045_p1, %p7044_p11 }
 0x4dc   : > { %5762 = dma.done.wait (!%p5410_p8), %s4726_s9, 256  }
 0x4dd   : > { %5764 = vsyncadd (!%p5410_p8), %s4726_s9, 4294967040  ;;  %s7046_s22 = sld [smem:[#allocation29_spill]]  ;;  %s7047_s26 = sld [smem:[#allocation25_spill]] }
 0x4de   : > { %s7048_s21 = sld [smem:[#allocation30_spill]]  ;;  %s7049_s19 = smov %s5771_s20 }
 0x4e3   : > { %p33_p13 = scmp.ge.s32.totalorder %s7046_s22, 4   ;;  %s7050_s20 = smov %s7047_s26 }
 0x4e5   :  { %35 = sbr.rel (!%p33_p13) target bundleno = 19 (0x13), region = 172 }
 0x4ec   :  { %4731 = vsyncpa [#allocation4], 1 }
 0x4ed   :  { %4733 = vsyncpa [#allocation4 + $0x1], 1 }
 0x4ee   :  { %4734 = vsyncpa [#allocation7], 1 }
 0x4ef   :  { %4736 = vsyncpa [#allocation7 + $0x1], 1 }
 0x4f0   :  { %4737 = vsyncpa [#allocation10], 1 }
 0x4f1   :  { %4739 = vsyncpa [#allocation10 + $0x1], 1 }
 0x4f2   :  { %4740 = vsyncpa [#allocation13], 1 }
 0x4f3   :  { %4741 = vsyncpa [#allocation16], 1 }
 0x4f4   :  { %4742 = vsyncpa [#allocation5], 1 }
 0x4f5   :  { %4744 = vsyncpa [#allocation5 + $0x1], 1 }

</bundles_post_ra>
